<compile_context>
chip_gen: v5e
topology: v5e:2x2
jax: 0.10.0
libtpu: 0.0.40
codegen_flags: <defaults>
</compile_context>

<pallas_src>
import math

import jax
import jax.numpy as jnp
from jax import lax
from jax.experimental import pallas as pl
from jax.experimental.pallas import tpu as pltpu

_LANE = 128
_INV_SQRT2 = 1.0 / math.sqrt(2.0)
_LN_EPS = 1e-5


def _round_up(n, m):
    return ((n + m - 1) // m) * m


def _gelu_exact(x):
    # nn.GELU() default is the exact erf-based GELU (kept exact; unrolling
    # hides the VPU polynomial under the next step's MXU push).
    return 0.5 * x * (1.0 + lax.erf(x * _INV_SQRT2))


def _pick_time_chunk(T, target=128):
    """Largest chunk <= target that tiles T and satisfies the (8,128) rule."""
    if T <= target:
        return T
    best = None
    for tc in range(8, target + 1, 8):
        if T % tc == 0:
            best = tc
    # Fallback: a single full-T chunk (correct, just not chunked).
    return best if best is not None else T


_VMEM_LIMIT_CACHE = [None]


def _vmem_limit_bytes():
    if _VMEM_LIMIT_CACHE[0] is None:
        limit = 64 * 1024 * 1024
        try:
            cap = getattr(pltpu.get_tpu_info(), "vmem_capacity_bytes", 0) or 0
            if cap > 0:
                limit = int(cap * 7 // 8)   # ~87.5% of per-generation physical
        except Exception:
            pass
        _VMEM_LIMIT_CACHE[0] = limit
    return _VMEM_LIMIT_CACHE[0]


def _gru_chunk_kernel(
    x_ref,      # (B, Tc, D)      current chunk of the input
    gamma_ref,  # (1, D)          LayerNorm scale
    beta_ref,   # (1, D)          LayerNorm shift
    wih_ref,    # (1, D, 3Hp)     this direction's input weights (bf16)
    whh_ref,    # (1, Hp, 3Hp)    this direction's recurrent weights (bf16)
    bx_ref,     # (1, 1, 3Hp)     b_ih + (r,z part of b_hh) folded (f32)
    bhn_ref,    # (1, 1, Hp)      n-gate hidden bias (f32)
    out_ref,    # (1, Tc, B, H)   time-major output block for this chunk
    h_ref,      # scratch (B, Hp) f32: hidden-state carry across chunks
    gx_ref,     # scratch (Tc, B, 3Hp) bf16: chunk input-side gate activations
    acc_ref,    # scratch (Tc, B, Hp) f32: post-GELU outputs (lane-dense)
):
    B, Tc, D = x_ref.shape
    Hp = h_ref.shape[1]
    H = out_ref.shape[3]
    G = 3 * Hp

    d = pl.program_id(0)   # 0 = forward, 1 = backward (time-reversed sweep)
    c = pl.program_id(1)   # chunk index within this direction's sweep

    # New direction sweep -> zero the hidden-state carry.
    @pl.when(c == 0)
    def _():
        h_ref[...] = jnp.zeros_like(h_ref)

    # ---- LayerNorm over the feature dim (eps=1e-5, biased variance) --------
    x = x_ref[...].astype(jnp.float32)
    mu = jnp.mean(x, axis=-1, keepdims=True)
    var = jnp.mean((x - mu) ** 2, axis=-1, keepdims=True)
    xn = (x - mu) * lax.rsqrt(var + _LN_EPS) * gamma_ref[...] + beta_ref[...]

    # ---- Chunk input projection on the MXU (bf16 in, f32 accumulate) -------
    # The only relayout happens here, per chunk, on the cheap D-wide tensor;
    # every per-step read/store below is then a contiguous (B, k*Hp) slab.
    xn_t = jnp.transpose(xn, (1, 0, 2)).reshape(Tc * B, D).astype(jnp.bfloat16)
    gx = jnp.dot(xn_t, wih_ref[0], preferred_element_type=jnp.float32) + bx_ref[0]
    gx_ref[...] = gx.reshape(Tc, B, G).astype(jnp.bfloat16)   # bf16: 1/2 VMEM+BW

    whh = whh_ref[0]                                  # (Hp, 3Hp) bf16, hoisted
    bhn = jnp.broadcast_to(bhn_ref[0], (B, Hp))       # hoisted out of the loop
    # TODO(synk): on v5e/v6e, keep whh resident in the MXU across the T loop
    # via pltpu.matmul_push_rhs / matmul_acc_lhs / matmul_pop.

    def step(s, h):
        # forward walks t = s; backward walks t = Tc-1-s (global reverse sweep)
        t = s + d * (Tc - 1 - 2 * s)
        gh = jnp.dot(h.astype(jnp.bfloat16), whh,
                     preferred_element_type=jnp.float32)       # (B, 3Hp)
        gx_t = gx_ref[t].astype(jnp.float32)                   # (B, 3Hp)
        # PyTorch GRU gate math; b_hh(r,z) already folded into gx_t.
        r = jax.nn.sigmoid(gx_t[:, :Hp] + gh[:, :Hp])
        z = jax.nn.sigmoid(gx_t[:, Hp:2 * Hp] + gh[:, Hp:2 * Hp])
        n = jnp.tanh(gx_t[:, 2 * Hp:] + r * (gh[:, 2 * Hp:] + bhn))
        h_new = (1.0 - z) * n + z * h
        # Full-Hp, lane-aligned store (unmasked vst); exact GELU fused in-step.
        acc_ref[t] = _gelu_exact(h_new)
        return h_new

    # Manual unroll x2: GELU, the acc store and the next gx load are NOT on
    # the h-carry chain; pairing steps lets the scheduler overlap them.
    h0 = h_ref[...]
    if Tc % 2 == 0:
        def step2(i, h):
            return step(2 * i + 1, step(2 * i, h))
        h_ref[...] = lax.fori_loop(0, Tc // 2, step2, h0)
    else:
        h_ref[...] = lax.fori_loop(0, Tc, step, h0)

    # One narrow lane-slice writeback per chunk; no in-kernel transpose.
    # TODO(synk): when H % 128 == 0, write batch-major (B,Tc,H) blocks directly
    # into a (B,T,2H) output via the out_spec lane index and drop the wrapper
    # relayout entirely.
    out_ref[0] = acc_ref[...][:, :, :H].astype(out_ref.dtype)
    # TODO(synk): training-mode dropout (p=0.1) omitted; eval mode is identity.


def _pad_gate_blocks(w, H, Hp):
    """(..., 3H) -> (..., 3Hp): gate g placed at [g*Hp, g*Hp+H), zero padded."""
    if Hp == H:
        return w
    pad = [(0, 0)] * (w.ndim - 1) + [(0, Hp - H)]
    return jnp.concatenate(
        [jnp.pad(w[..., g * H:(g + 1) * H], pad) for g in range(3)], axis=-1)


def _fuse_params(params, H, Hp):
    """Per-direction padded weights stacked on a leading direction axis."""
    def prep(wih, whh, bih, bhh):
        wih_p = _pad_gate_blocks(wih, H, Hp)                        # (D, 3Hp)
        whh_p = jnp.pad(_pad_gate_blocks(whh, H, Hp),
                        ((0, Hp - H), (0, 0)))                      # (Hp, 3Hp)
        # Fold the r/z parts of b_hh into the precomputed input-side bias.
        bhh_rz = jnp.concatenate(
            [bhh[:, :2 * H], jnp.zeros_like(bhh[:, 2 * H:])], axis=-1)
        bx_p = _pad_gate_blocks(bih + bhh_rz, H, Hp)                # (1, 3Hp)
        bhn_p = jnp.pad(bhh[:, 2 * H:], ((0, 0), (0, Hp - H)))      # (1, Hp)
        return wih_p, whh_p, bx_p, bhn_p

    f = prep(params["wih_f"], params["whh_f"], params["bih_f"], params["bhh_f"])
    b = prep(params["wih_b"], params["whh_b"], params["bih_b"], params["bhh_b"])
    wih_s = jnp.stack([f[0], b[0]]).astype(jnp.bfloat16)   # (2, D, 3Hp)
    whh_s = jnp.stack([f[1], b[1]]).astype(jnp.bfloat16)   # (2, Hp, 3Hp)
    bx_s = jnp.stack([f[2], b[2]])                         # (2, 1, 3Hp) f32
    bhn_s = jnp.stack([f[3], b[3]])                        # (2, 1, Hp)  f32
    return wih_s, whh_s, bx_s, bhn_s


@jax.jit
def bidirectional_gru_block(x, params):
    B, T, D = x.shape
    H = params["whh_f"].shape[0]
    Hp = _round_up(H, _LANE)
    Tc = _pick_time_chunk(T)
    nc = T // Tc

    wih_s, whh_s, bx_s, bhn_s = _fuse_params(params, H, Hp)

    def sel(d, c):   # chunk order: forward 0..nc-1, backward nc-1..0
        return c + d * (nc - 1 - 2 * c)

    out_tm = pl.pallas_call(
        _gru_chunk_kernel,
        out_shape=jax.ShapeDtypeStruct((2, T, B, H), x.dtype),
        grid=(2, nc),
        in_specs=[
            pl.BlockSpec((B, Tc, D), lambda d, c: (0, sel(d, c), 0)),
            pl.BlockSpec((1, D), lambda d, c: (0, 0)),
            pl.BlockSpec((1, D), lambda d, c: (0, 0)),
            pl.BlockSpec((1, D, 3 * Hp), lambda d, c: (d, 0, 0)),
            pl.BlockSpec((1, Hp, 3 * Hp), lambda d, c: (d, 0, 0)),
            pl.BlockSpec((1, 1, 3 * Hp), lambda d, c: (d, 0, 0)),
            pl.BlockSpec((1, 1, Hp), lambda d, c: (d, 0, 0)),
        ],
        out_specs=pl.BlockSpec((1, Tc, B, H), lambda d, c: (d, sel(d, c), 0, 0)),
        scratch_shapes=[
            pltpu.VMEM((B, Hp), jnp.float32),            # hidden-state carry
            pltpu.VMEM((Tc, B, 3 * Hp), jnp.bfloat16),   # chunk gate precompute
            pltpu.VMEM((Tc, B, Hp), jnp.float32),        # post-GELU chunk accum
        ],
        compiler_params=pltpu.CompilerParams(
            # direction axis parallel -> v7x splits fwd/bwd across its 2 TCs;
            # chunk axis carries the recurrence -> arbitrary.
            dimension_semantics=("parallel", "arbitrary"),
            vmem_limit_bytes=_vmem_limit_bytes(),
        ),
    )(x, params["gamma"], params["beta"], wih_s, whh_s, bx_s, bhn_s)

    # (dir, T, B, H) -> (B, T, 2H); forward -> [..., :H], backward -> [..., H:]
    # (single fused XLA HBM copy, off the kernel's serial path).
    return jnp.transpose(out_tm, (2, 1, 0, 3)).reshape(B, T, 2 * H)


def init_params(key, input_size, hidden_size):
    """Deterministic init mimicking PyTorch GRU: U(-1/sqrt(H), 1/sqrt(H))."""
    k = 1.0 / math.sqrt(hidden_size)
    keys = jax.random.split(key, 8)

    def u(kk, shape):
        return jax.random.uniform(kk, shape, jnp.float32, minval=-k, maxval=k)

    D, H = input_size, hidden_size
    return dict(
        gamma=jnp.ones((1, D), jnp.float32),
        beta=jnp.zeros((1, D), jnp.float32),
        # forward direction
        wih_f=u(keys[0], (D, 3 * H)),
        whh_f=u(keys[1], (H, 3 * H)),
        bih_f=u(keys[2], (1, 3 * H)),
        bhh_f=u(keys[3], (1, 3 * H)),
        # backward (reverse) direction
        wih_b=u(keys[4], (D, 3 * H)),
        whh_b=u(keys[5], (H, 3 * H)),
        bih_b=u(keys[6], (1, 3 * H)),
        bhh_b=u(keys[7], (1, 3 * H)),
    )


if __name__ == "__main__":
    B, T, D, H = 2, 8, 16, 32   # batch, seq, input_size, hidden_size

    root = jax.random.PRNGKey(0)
    kp, kx = jax.random.split(root)
    params = init_params(kp, D, H)
    x = jax.random.normal(kx, (B, T, D), jnp.float32)

    y = bidirectional_gru_block(x, params)
    y = jax.block_until_ready(y)

    assert y.shape == (B, T, 2 * H), y.shape
    assert y.dtype == jnp.float32
    assert bool(jnp.all(jnp.isfinite(y)))
    print("KERNEL_OK")
</pallas_src>

<mosaic_0001>
module attributes {stable_mosaic.version = 11 : i64} {
  func.func @_gru_chunk_kernel(%arg0: i32, %arg1: i32, %arg2: memref<2x8x16xf32, #tpu.memory_space<vmem>>, %arg3: memref<1x16xf32, #tpu.memory_space<vmem>>, %arg4: memref<1x16xf32, #tpu.memory_space<vmem>>, %arg5: memref<1x16x384xbf16, #tpu.memory_space<vmem>>, %arg6: memref<1x128x384xbf16, #tpu.memory_space<vmem>>, %arg7: memref<1x1x384xf32, #tpu.memory_space<vmem>>, %arg8: memref<1x1x128xf32, #tpu.memory_space<vmem>>, %arg9: memref<1x8x2x32xf32, #tpu.memory_space<vmem>>, %arg10: memref<2x128xf32, #tpu.memory_space<vmem>>, %arg11: memref<8x2x384xbf16, #tpu.memory_space<vmem>>, %arg12: memref<8x2x128xf32, #tpu.memory_space<vmem>>) attributes {dimension_semantics = [#tpu.dimension_semantics<parallel>, #tpu.dimension_semantics<arbitrary>], iteration_bounds = array<i64: 2, 1>, scalar_prefetch = 0 : i64, scratch_operands = 3 : i64, tpu.core_type = #tpu.core_type<tc>, window_params = [{transform_indices = @transform_0, window_bounds = array<i64: 2, 8, 16>}, {pipeline_mode = #tpu.pipeline_mode<synchronous>, transform_indices = @transform_1, window_bounds = array<i64: 1, 16>}, {pipeline_mode = #tpu.pipeline_mode<synchronous>, transform_indices = @transform_2, window_bounds = array<i64: 1, 16>}, {transform_indices = @transform_3, window_bounds = array<i64: 1, 16, 384>}, {transform_indices = @transform_4, window_bounds = array<i64: 1, 128, 384>}, {transform_indices = @transform_5, window_bounds = array<i64: 1, 1, 384>}, {transform_indices = @transform_6, window_bounds = array<i64: 1, 1, 128>}, {transform_indices = @transform_7, window_bounds = array<i64: 1, 8, 2, 32>}]} {
    %c0_i32 = arith.constant 0 : i32
    %0 = arith.cmpi eq, %arg1, %c0_i32 : i32
    %1 = arith.extui %0 : i1 to i32
    %c0_i32_0 = arith.constant 0 : i32
    %2 = arith.cmpi ne, %1, %c0_i32_0 : i32
    scf.if %2 {
      %cst_40 = arith.constant 0.000000e+00 : f32
      %58 = vector.broadcast %cst_40 : f32 to vector<2x128xf32>
      %c0_41 = arith.constant 0 : index
      %c0_42 = arith.constant 0 : index
      %59 = vector.load %arg10[%c0_41, %c0_42] : memref<2x128xf32, #tpu.memory_space<vmem>>, vector<2x128xf32>
      tpu.vector_store %arg10[%c0_41, %c0_42], %58 {strides = array<i32>} : memref<2x128xf32, #tpu.memory_space<vmem>>, vector<2x128xf32>,
    } else {
    }
    %c0 = arith.constant 0 : index
    %c0_1 = arith.constant 0 : index
    %c0_2 = arith.constant 0 : index
    %3 = vector.load %arg2[%c0, %c0_1, %c0_2] : memref<2x8x16xf32, #tpu.memory_space<vmem>>, vector<2x8x16xf32>
    %cst = arith.constant dense<0.000000e+00> : vector<2x8xf32>
    %4 = vector.multi_reduction <add>, %3, %cst [2] : vector<2x8x16xf32> to vector<2x8xf32>
    %5 = vector.shape_cast %4 : vector<2x8xf32> to vector<2x8x1xf32>
    %cst_3 = arith.constant 1.600000e+01 : f32
    %6 = vector.broadcast %cst_3 : f32 to vector<2x8x1xf32>
    %7 = arith.divf %5, %6 : vector<2x8x1xf32>
    %8 = vector.broadcast %7 : vector<2x8x1xf32> to vector<2x8x16xf32>
    %9 = arith.subf %3, %8 : vector<2x8x16xf32>
    %10 = arith.mulf %9, %9 : vector<2x8x16xf32>
    %cst_4 = arith.constant dense<0.000000e+00> : vector<2x8xf32>
    %11 = vector.multi_reduction <add>, %10, %cst_4 [2] : vector<2x8x16xf32> to vector<2x8xf32>
    %12 = vector.shape_cast %11 : vector<2x8xf32> to vector<2x8x1xf32>
    %cst_5 = arith.constant 1.600000e+01 : f32
    %13 = vector.broadcast %cst_5 : f32 to vector<2x8x1xf32>
    %14 = arith.divf %12, %13 : vector<2x8x1xf32>
    %15 = vector.broadcast %7 : vector<2x8x1xf32> to vector<2x8x16xf32>
    %16 = arith.subf %3, %15 : vector<2x8x16xf32>
    %cst_6 = arith.constant 9.99999974E-6 : f32
    %17 = vector.broadcast %cst_6 : f32 to vector<2x8x1xf32>
    %18 = arith.addf %14, %17 : vector<2x8x1xf32>
    %19 = math.rsqrt %18 : vector<2x8x1xf32>
    %20 = vector.broadcast %19 : vector<2x8x1xf32> to vector<2x8x16xf32>
    %21 = arith.mulf %16, %20 : vector<2x8x16xf32>
    %c0_7 = arith.constant 0 : index
    %c0_8 = arith.constant 0 : index
    %22 = vector.load %arg3[%c0_7, %c0_8] : memref<1x16xf32, #tpu.memory_space<vmem>>, vector<1x16xf32>
    %23 = vector.shape_cast %22 : vector<1x16xf32> to vector<1x1x16xf32>
    %24 = vector.broadcast %23 : vector<1x1x16xf32> to vector<2x8x16xf32>
    %25 = arith.mulf %21, %24 : vector<2x8x16xf32>
    %c0_9 = arith.constant 0 : index
    %c0_10 = arith.constant 0 : index
    %26 = vector.load %arg4[%c0_9, %c0_10] : memref<1x16xf32, #tpu.memory_space<vmem>>, vector<1x16xf32>
    %27 = vector.shape_cast %26 : vector<1x16xf32> to vector<1x1x16xf32>
    %28 = vector.broadcast %27 : vector<1x1x16xf32> to vector<2x8x16xf32>
    %29 = arith.addf %25, %28 : vector<2x8x16xf32>
    %30 = tpu.transpose %29, [1, 0, 2] : vector<2x8x16xf32> -> vector<8x2x16xf32>
    %31 = vector.shape_cast %30 : vector<8x2x16xf32> to vector<16x16xf32>
    %32 = arith.truncf %31 : vector<16x16xf32> to vector<16x16xbf16>
    %c0_11 = arith.constant 0 : index
    %c0_12 = arith.constant 0 : index
    %c0_13 = arith.constant 0 : index
    %33 = vector.load %arg5[%c0_11, %c0_12, %c0_13] : memref<1x16x384xbf16, #tpu.memory_space<vmem>>, vector<1x16x384xbf16>
    %34 = vector.shape_cast %33 : vector<1x16x384xbf16> to vector<16x384xbf16>
    %cst_14 = arith.constant dense<0.000000e+00> : vector<16x384xf32>
    %35 = tpu.matmul %32, %34, %cst_14 {dimension_numbers = #tpu.dot_dimension_numbers<[1], [0], [0], [1], [0, 0, 1, 1], [], []>} : vector<16x16xbf16>, vector<16x384xbf16>, vector<16x384xf32> -> vector<16x384xf32>
    %c0_15 = arith.constant 0 : index
    %c0_16 = arith.constant 0 : index
    %c0_17 = arith.constant 0 : index
    %36 = vector.load %arg7[%c0_15, %c0_16, %c0_17] : memref<1x1x384xf32, #tpu.memory_space<vmem>>, vector<1x1x384xf32>
    %37 = vector.shape_cast %36 : vector<1x1x384xf32> to vector<1x384xf32>
    %38 = vector.broadcast %37 : vector<1x384xf32> to vector<16x384xf32>
    %39 = arith.addf %35, %38 : vector<16x384xf32>
    %40 = vector.shape_cast %39 : vector<16x384xf32> to vector<8x2x384xf32>
    %41 = arith.truncf %40 : vector<8x2x384xf32> to vector<8x2x384xbf16>
    %c0_18 = arith.constant 0 : index
    %c0_19 = arith.constant 0 : index
    %c0_20 = arith.constant 0 : index
    %42 = vector.load %arg11[%c0_18, %c0_19, %c0_20] : memref<8x2x384xbf16, #tpu.memory_space<vmem>>, vector<8x2x384xbf16>
    tpu.vector_store %arg11[%c0_18, %c0_19, %c0_20], %41 {strides = array<i32>} : memref<8x2x384xbf16, #tpu.memory_space<vmem>>, vector<8x2x384xbf16>,
    %c0_21 = arith.constant 0 : index
    %c0_22 = arith.constant 0 : index
    %c0_23 = arith.constant 0 : index
    %43 = vector.load %arg6[%c0_21, %c0_22, %c0_23] : memref<1x128x384xbf16, #tpu.memory_space<vmem>>, vector<1x128x384xbf16>
    %44 = vector.shape_cast %43 : vector<1x128x384xbf16> to vector<128x384xbf16>
    %c0_24 = arith.constant 0 : index
    %c0_25 = arith.constant 0 : index
    %c0_26 = arith.constant 0 : index
    %45 = vector.load %arg8[%c0_24, %c0_25, %c0_26] : memref<1x1x128xf32, #tpu.memory_space<vmem>>, vector<1x1x128xf32>
    %46 = vector.shape_cast %45 : vector<1x1x128xf32> to vector<1x128xf32>
    %47 = vector.shape_cast %46 : vector<1x128xf32> to vector<1x128xf32>
    %48 = vector.broadcast %47 : vector<1x128xf32> to vector<2x128xf32>
    %c0_27 = arith.constant 0 : index
    %c0_28 = arith.constant 0 : index
    %49 = vector.load %arg10[%c0_27, %c0_28] : memref<2x128xf32, #tpu.memory_space<vmem>>, vector<2x128xf32>
    %c0_i32_29 = arith.constant 0 : i32
    %c4_i32 = arith.constant 4 : i32
    %50 = arith.addi %c0_i32_29, %c4_i32 : i32
    %c1_i32 = arith.constant 1 : i32
    %51 = scf.for %arg13 = %c0_i32_29 to %50 step %c1_i32 iter_args(%arg14 = %49) -> (vector<2x128xf32>)  : i32 {
      %c2_i32 = arith.constant 2 : i32
      %58 = arith.muli %c2_i32, %arg13 : i32
      %c1_i32_40 = arith.constant 1 : i32
      %59 = arith.addi %58, %c1_i32_40 : i32
      %c2_i32_41 = arith.constant 2 : i32
      %60 = arith.muli %c2_i32_41, %arg13 : i32
      %c2_i32_42 = arith.constant 2 : i32
      %61 = arith.muli %c2_i32_42, %60 : i32
      %c7_i32 = arith.constant 7 : i32
      %62 = arith.subi %c7_i32, %61 : i32
      %63 = arith.muli %arg0, %62 : i32
      %64 = arith.addi %60, %63 : i32
      %65 = arith.truncf %arg14 : vector<2x128xf32> to vector<2x128xbf16>
      %cst_43 = arith.constant dense<0.000000e+00> : vector<2x384xf32>
      %66 = tpu.matmul %65, %44, %cst_43 {dimension_numbers = #tpu.dot_dimension_numbers<[1], [0], [0], [1], [0, 0, 1, 1], [], []>} : vector<2x128xbf16>, vector<128x384xbf16>, vector<2x384xf32> -> vector<2x384xf32>
      %67 = arith.index_cast %64 : i32 to index
      %c0_44 = arith.constant 0 : index
      %c0_45 = arith.constant 0 : index
      %68 = vector.load %arg11[%67, %c0_44, %c0_45] : memref<8x2x384xbf16, #tpu.memory_space<vmem>>, vector<1x2x384xbf16>
      %69 = vector.shape_cast %68 : vector<1x2x384xbf16> to vector<2x384xbf16>
      %70 = arith.extf %69 : vector<2x384xbf16> to vector<2x384xf32>
      %71 = vector.extract_strided_slice %70 {offsets = [0, 0], sizes = [2, 128], strides = [1, 1]} : vector<2x384xf32> to vector<2x128xf32>
      %72 = vector.extract_strided_slice %66 {offsets = [0, 0], sizes = [2, 128], strides = [1, 1]} : vector<2x384xf32> to vector<2x128xf32>
      %73 = arith.addf %71, %72 : vector<2x128xf32>
      %74 = arith.negf %73 : vector<2x128xf32>
      %75 = math.exp %74 : vector<2x128xf32>
      %cst_46 = arith.constant 1.000000e+00 : f32
      %76 = vector.broadcast %cst_46 : f32 to vector<2x128xf32>
      %77 = arith.addf %76, %75 : vector<2x128xf32>
      %78 = arith.divf %76, %77 : vector<2x128xf32>
      %79 = vector.extract_strided_slice %70 {offsets = [0, 128], sizes = [2, 128], strides = [1, 1]} : vector<2x384xf32> to vector<2x128xf32>
      %80 = vector.extract_strided_slice %66 {offsets = [0, 128], sizes = [2, 128], strides = [1, 1]} : vector<2x384xf32> to vector<2x128xf32>
      %81 = arith.addf %79, %80 : vector<2x128xf32>
      %82 = arith.negf %81 : vector<2x128xf32>
      %83 = math.exp %82 : vector<2x128xf32>
      %cst_47 = arith.constant 1.000000e+00 : f32
      %84 = vector.broadcast %cst_47 : f32 to vector<2x128xf32>
      %85 = arith.addf %84, %83 : vector<2x128xf32>
      %86 = arith.divf %84, %85 : vector<2x128xf32>
      %87 = vector.extract_strided_slice %70 {offsets = [0, 256], sizes = [2, 128], strides = [1, 1]} : vector<2x384xf32> to vector<2x128xf32>
      %88 = vector.extract_strided_slice %66 {offsets = [0, 256], sizes = [2, 128], strides = [1, 1]} : vector<2x384xf32> to vector<2x128xf32>
      %89 = arith.addf %88, %48 : vector<2x128xf32>
      %90 = arith.mulf %78, %89 : vector<2x128xf32>
      %91 = arith.addf %87, %90 : vector<2x128xf32>
      %92 = math.tanh %91 : vector<2x128xf32>
      %cst_48 = arith.constant 1.000000e+00 : f32
      %93 = vector.broadcast %cst_48 : f32 to vector<2x128xf32>
      %94 = arith.subf %93, %86 : vector<2x128xf32>
      %95 = arith.mulf %94, %92 : vector<2x128xf32>
      %96 = arith.mulf %86, %arg14 : vector<2x128xf32>
      %97 = arith.addf %95, %96 : vector<2x128xf32>
      %cst_49 = arith.constant 5.000000e-01 : f32
      %98 = vector.broadcast %cst_49 : f32 to vector<2x128xf32>
      %99 = arith.mulf %98, %97 : vector<2x128xf32>
      %cst_50 = arith.constant 0.707106769 : f32
      %100 = vector.broadcast %cst_50 : f32 to vector<2x128xf32>
      %101 = arith.mulf %97, %100 : vector<2x128xf32>
      %102 = math.erf %101 : vector<2x128xf32>
      %cst_51 = arith.constant 1.000000e+00 : f32
      %103 = vector.broadcast %cst_51 : f32 to vector<2x128xf32>
      %104 = arith.addf %103, %102 : vector<2x128xf32>
      %105 = arith.mulf %99, %104 : vector<2x128xf32>
      %106 = arith.index_cast %64 : i32 to index
      %c0_52 = arith.constant 0 : index
      %c0_53 = arith.constant 0 : index
      %107 = vector.load %arg12[%106, %c0_52, %c0_53] : memref<8x2x128xf32, #tpu.memory_space<vmem>>, vector<1x2x128xf32>
      %108 = vector.shape_cast %107 : vector<1x2x128xf32> to vector<2x128xf32>
      %109 = vector.shape_cast %105 : vector<2x128xf32> to vector<1x2x128xf32>
      tpu.vector_store %arg12[%106, %c0_52, %c0_53], %109 {strides = array<i32>} : memref<8x2x128xf32, #tpu.memory_space<vmem>>, vector<1x2x128xf32>,
      %c2_i32_54 = arith.constant 2 : i32
      %110 = arith.muli %c2_i32_54, %59 : i32
      %c7_i32_55 = arith.constant 7 : i32
      %111 = arith.subi %c7_i32_55, %110 : i32
      %112 = arith.muli %arg0, %111 : i32
      %113 = arith.addi %59, %112 : i32
      %114 = arith.truncf %97 : vector<2x128xf32> to vector<2x128xbf16>
      %cst_56 = arith.constant dense<0.000000e+00> : vector<2x384xf32>
      %115 = tpu.matmul %114, %44, %cst_56 {dimension_numbers = #tpu.dot_dimension_numbers<[1], [0], [0], [1], [0, 0, 1, 1], [], []>} : vector<2x128xbf16>, vector<128x384xbf16>, vector<2x384xf32> -> vector<2x384xf32>
      %116 = arith.index_cast %113 : i32 to index
      %c0_57 = arith.constant 0 : index
      %c0_58 = arith.constant 0 : index
      %117 = vector.load %arg11[%116, %c0_57, %c0_58] : memref<8x2x384xbf16, #tpu.memory_space<vmem>>, vector<1x2x384xbf16>
      %118 = vector.shape_cast %117 : vector<1x2x384xbf16> to vector<2x384xbf16>
      %119 = arith.extf %118 : vector<2x384xbf16> to vector<2x384xf32>
      %120 = vector.extract_strided_slice %119 {offsets = [0, 0], sizes = [2, 128], strides = [1, 1]} : vector<2x384xf32> to vector<2x128xf32>
      %121 = vector.extract_strided_slice %115 {offsets = [0, 0], sizes = [2, 128], strides = [1, 1]} : vector<2x384xf32> to vector<2x128xf32>
      %122 = arith.addf %120, %121 : vector<2x128xf32>
      %123 = arith.negf %122 : vector<2x128xf32>
      %124 = math.exp %123 : vector<2x128xf32>
      %cst_59 = arith.constant 1.000000e+00 : f32
      %125 = vector.broadcast %cst_59 : f32 to vector<2x128xf32>
      %126 = arith.addf %125, %124 : vector<2x128xf32>
      %127 = arith.divf %125, %126 : vector<2x128xf32>
      %128 = vector.extract_strided_slice %119 {offsets = [0, 128], sizes = [2, 128], strides = [1, 1]} : vector<2x384xf32> to vector<2x128xf32>
      %129 = vector.extract_strided_slice %115 {offsets = [0, 128], sizes = [2, 128], strides = [1, 1]} : vector<2x384xf32> to vector<2x128xf32>
      %130 = arith.addf %128, %129 : vector<2x128xf32>
      %131 = arith.negf %130 : vector<2x128xf32>
      %132 = math.exp %131 : vector<2x128xf32>
      %cst_60 = arith.constant 1.000000e+00 : f32
      %133 = vector.broadcast %cst_60 : f32 to vector<2x128xf32>
      %134 = arith.addf %133, %132 : vector<2x128xf32>
      %135 = arith.divf %133, %134 : vector<2x128xf32>
      %136 = vector.extract_strided_slice %119 {offsets = [0, 256], sizes = [2, 128], strides = [1, 1]} : vector<2x384xf32> to vector<2x128xf32>
      %137 = vector.extract_strided_slice %115 {offsets = [0, 256], sizes = [2, 128], strides = [1, 1]} : vector<2x384xf32> to vector<2x128xf32>
      %138 = arith.addf %137, %48 : vector<2x128xf32>
      %139 = arith.mulf %127, %138 : vector<2x128xf32>
      %140 = arith.addf %136, %139 : vector<2x128xf32>
      %141 = math.tanh %140 : vector<2x128xf32>
      %cst_61 = arith.constant 1.000000e+00 : f32
      %142 = vector.broadcast %cst_61 : f32 to vector<2x128xf32>
      %143 = arith.subf %142, %135 : vector<2x128xf32>
      %144 = arith.mulf %143, %141 : vector<2x128xf32>
      %145 = arith.mulf %135, %97 : vector<2x128xf32>
      %146 = arith.addf %144, %145 : vector<2x128xf32>
      %cst_62 = arith.constant 5.000000e-01 : f32
      %147 = vector.broadcast %cst_62 : f32 to vector<2x128xf32>
      %148 = arith.mulf %147, %146 : vector<2x128xf32>
      %cst_63 = arith.constant 0.707106769 : f32
      %149 = vector.broadcast %cst_63 : f32 to vector<2x128xf32>
      %150 = arith.mulf %146, %149 : vector<2x128xf32>
      %151 = math.erf %150 : vector<2x128xf32>
      %cst_64 = arith.constant 1.000000e+00 : f32
      %152 = vector.broadcast %cst_64 : f32 to vector<2x128xf32>
      %153 = arith.addf %152, %151 : vector<2x128xf32>
      %154 = arith.mulf %148, %153 : vector<2x128xf32>
      %155 = arith.index_cast %113 : i32 to index
      %c0_65 = arith.constant 0 : index
      %c0_66 = arith.constant 0 : index
      %156 = vector.load %arg12[%155, %c0_65, %c0_66] : memref<8x2x128xf32, #tpu.memory_space<vmem>>, vector<1x2x128xf32>
      %157 = vector.shape_cast %156 : vector<1x2x128xf32> to vector<2x128xf32>
      %158 = vector.shape_cast %154 : vector<2x128xf32> to vector<1x2x128xf32>
      tpu.vector_store %arg12[%155, %c0_65, %c0_66], %158 {strides = array<i32>} : memref<8x2x128xf32, #tpu.memory_space<vmem>>, vector<1x2x128xf32>,
      scf.yield %146 : vector<2x128xf32>
    }
    %c4_i32_30 = arith.constant 4 : i32
    %c0_31 = arith.constant 0 : index
    %c0_32 = arith.constant 0 : index
    %52 = vector.load %arg10[%c0_31, %c0_32] : memref<2x128xf32, #tpu.memory_space<vmem>>, vector<2x128xf32>
    tpu.vector_store %arg10[%c0_31, %c0_32], %51 {strides = array<i32>} : memref<2x128xf32, #tpu.memory_space<vmem>>, vector<2x128xf32>,
    %c0_33 = arith.constant 0 : index
    %c0_34 = arith.constant 0 : index
    %c0_35 = arith.constant 0 : index
    %53 = vector.load %arg12[%c0_33, %c0_34, %c0_35] : memref<8x2x128xf32, #tpu.memory_space<vmem>>, vector<8x2x128xf32>
    %54 = vector.extract_strided_slice %53 {offsets = [0, 0, 0], sizes = [8, 2, 32], strides = [1, 1, 1]} : vector<8x2x128xf32> to vector<8x2x32xf32>
    %c0_36 = arith.constant 0 : index
    %c0_37 = arith.constant 0 : index
    %c0_38 = arith.constant 0 : index
    %c0_39 = arith.constant 0 : index
    %55 = vector.load %arg9[%c0_36, %c0_37, %c0_38, %c0_39] : memref<1x8x2x32xf32, #tpu.memory_space<vmem>>, vector<1x8x2x32xf32>
    %56 = vector.shape_cast %55 : vector<1x8x2x32xf32> to vector<8x2x32xf32>
    %57 = vector.shape_cast %54 : vector<8x2x32xf32> to vector<1x8x2x32xf32>
    tpu.vector_store %arg9[%c0_36, %c0_37, %c0_38, %c0_39], %57 {strides = array<i32>} : memref<1x8x2x32xf32, #tpu.memory_space<vmem>>, vector<1x8x2x32xf32>,
    return
  }
  func.func @transform_0(%arg0: i32, %arg1: i32) -> (i32, i32, i32) {
    %c2_i32 = arith.constant 2 : i32
    %0 = arith.muli %c2_i32, %arg1 : i32
    %c0_i32 = arith.constant 0 : i32
    %1 = arith.subi %c0_i32, %0 : i32
    %2 = arith.muli %arg0, %1 : i32
    %3 = arith.addi %arg1, %2 : i32
    %c0_i32_0 = arith.constant 0 : i32
    %c0_i32_1 = arith.constant 0 : i32
    %c0_i32_2 = arith.constant 0 : i32
    return %c0_i32_0, %3, %c0_i32_1 : i32, i32, i32
  }
  func.func @transform_1(%arg0: i32, %arg1: i32) -> (i32, i32) {
    %c0_i32 = arith.constant 0 : i32
    %c0_i32_0 = arith.constant 0 : i32
    %c0_i32_1 = arith.constant 0 : i32
    return %c0_i32, %c0_i32_0 : i32, i32
  }
  func.func @transform_2(%arg0: i32, %arg1: i32) -> (i32, i32) {
    %c0_i32 = arith.constant 0 : i32
    %c0_i32_0 = arith.constant 0 : i32
    %c0_i32_1 = arith.constant 0 : i32
    return %c0_i32, %c0_i32_0 : i32, i32
  }
  func.func @transform_3(%arg0: i32, %arg1: i32) -> (i32, i32, i32) {
    %c0_i32 = arith.constant 0 : i32
    %c0_i32_0 = arith.constant 0 : i32
    %c0_i32_1 = arith.constant 0 : i32
    return %arg0, %c0_i32, %c0_i32_0 : i32, i32, i32
  }
  func.func @transform_4(%arg0: i32, %arg1: i32) -> (i32, i32, i32) {
    %c0_i32 = arith.constant 0 : i32
    %c0_i32_0 = arith.constant 0 : i32
    %c0_i32_1 = arith.constant 0 : i32
    return %arg0, %c0_i32, %c0_i32_0 : i32, i32, i32
  }
  func.func @transform_5(%arg0: i32, %arg1: i32) -> (i32, i32, i32) {
    %c0_i32 = arith.constant 0 : i32
    %c0_i32_0 = arith.constant 0 : i32
    %c0_i32_1 = arith.constant 0 : i32
    return %arg0, %c0_i32, %c0_i32_0 : i32, i32, i32
  }
  func.func @transform_6(%arg0: i32, %arg1: i32) -> (i32, i32, i32) {
    %c0_i32 = arith.constant 0 : i32
    %c0_i32_0 = arith.constant 0 : i32
    %c0_i32_1 = arith.constant 0 : i32
    return %arg0, %c0_i32, %c0_i32_0 : i32, i32, i32
  }
  func.func @transform_7(%arg0: i32, %arg1: i32) -> (i32, i32, i32, i32) {
    %c2_i32 = arith.constant 2 : i32
    %0 = arith.muli %c2_i32, %arg1 : i32
    %c0_i32 = arith.constant 0 : i32
    %1 = arith.subi %c0_i32, %0 : i32
    %2 = arith.muli %arg0, %1 : i32
    %3 = arith.addi %arg1, %2 : i32
    %c0_i32_0 = arith.constant 0 : i32
    %c0_i32_1 = arith.constant 0 : i32
    %c0_i32_2 = arith.constant 0 : i32
    return %arg0, %3, %c0_i32_0, %c0_i32_1 : i32, i32, i32, i32
  }
}

</mosaic_0001>

<bundles_post_ra>
// kernel: bidirectional_gru_block.1
= control target key start
LH: loop header
LB: loop body
LE: loop exit
PB: predicated region body
PF: predicated region fallthrough
CT: control target
= control target key end

     0   :  { %s1854_s24 = smov 0   ;;  %s1856_s25 = smov 0   ;;  %s2260_s0 = inlined_call_operand.vmem [shape: f32[2,8,16], index: 0, kind: input, shape index: {}]   ;;  %s2261_s1 = inlined_call_operand.vmem [shape: f32[1,16], index: 1, kind: input, shape index: {}]   ;;  %s2262_s2 = inlined_call_operand.vmem [shape: f32[1,16], index: 2, kind: input, shape index: {}]   ;;  %s2263_s3 = inlined_call_operand.vmem [shape: bf16[2,16,384], index: 3, kind: input, shape index: {}]   ;;  %s2264_s4 = inlined_call_operand.vmem [shape: bf16[2,128,384], index: 4, kind: input, shape index: {}]   ;;  %s2265_s5 = inlined_call_operand.vmem [shape: f32[2,1,384], index: 5, kind: input, shape index: {}]   ;;  %s2266_s6 = inlined_call_operand.vmem [shape: f32[2,1,128], index: 6, kind: input, shape index: {}]   ;;  %s2267_s7 = inlined_call_operand.vmem [shape: f32[2,8,2,32], index: 7, kind: output, shape index: {}]  }
   0x1   :  { %s1858_s26 = smov 0  }
   0x2 LB: > { %s29_s27 = sadd.s32 1, %s1796_s25  ;;  %p1526_p0 = scmp.ge.s32.totalorder %s1800_s26, 1  ;;  %s1800_s26 = sphi %s1858_s26, %s17_s26   ;;  %s1796_s25 = sphi %s1856_s25, %s2299_s25   ;;  %s1792_s24 = sphi %s1854_s24, %s2298_s24  }
   0x3   : > { %p31_p1 = scmp.ge.s32.totalorder %s29_s27, 2  ;;  %p311_p2 = scmp.lt.s32.totalorder %s1800_s26, 3 }
   0x5   : > { %s2301_s27 = smov (%p31_p1, %s29_s27), 0  ;;  %p312_p3 = pnand %p1526_p0, %p311_p2 }
   0x7   : > { %315 = sbr.rel (%p312_p3) target bundleno = 947 (0x3b3), region = 48 }
   0xc   : > { %v424_v0 = vld [vmem:[%s2260_s0] sm:$0xff]  ;;  %vm426_vm0 = vcmask 130048   ;;  %v425_v2 = vld [vmem:[%s2260_s0 + $0x8] sm:$0xff]  ;;  %v1810_v4 = vmov 16.0   ;;  %p383_p4 = scmp.lt.s32.totalorder %s1792_s24, 1  ;;  %v1811_v36 = vmov 0.0  }
   0xd   : > { %v427_v1 = vsel %vm426_vm0, %v424_v0, 0.0  ;;  %v430_v3 = vsel %vm426_vm0, %v425_v2, 0.0  ;;  %1740 = vrcp.f32 %v1810_v4  ;;  %v1922_v35 = vld [vmem:[%s2261_s1] ss:$0 sm:$0xff]  ;;  %423 = vst [vmem:[#allocation2] sm:$0x3] %v1811_v36 }
   0xe   : > { %428 = vadd.xlane.f32.xlu0 %v427_v1  ;;  %s1890_s9 = scalar_select %p383_p4, %s1792_s24, 1  ;;  %v1738_v45 = vld [vmem:[%s2262_s2] ss:$0 sm:$0xff]  ;;  %v1812_v60 = vmov 1983009808   ;;  %vm491_vm5 = vcmask 1047556  }
   0xf   : > { %v494_v61 = vunpack.c.l.s4 %v1812_v60  ;;  %vm654_vm9 = vcmask 1041408   ;;  %vm658_vm10 = vcmask 1043458   ;;  %vm656_vm11 = vcmask 1043456  }
  0x10   : > { %s399_s12 = scalar_lea.vmem %s2266_s6, %s1890_s9  ;;  %s1659_s13 = sshll.u32 %s1890_s9, 4  ;;  %vm660_vm12 = vcmask 1045506   ;;  %vm663_vm13 = vcmask 1045508   ;;  %vm667_vm14 = vcmask 1045504   ;;  %vm795_vm15 = vcmask 1040384  }
  0x11   : > { %s1900_s16 = scalar_lea.vmem %s2267_s7, %s1659_s13  ;;  %s1690_s17 = smul.u32 24, %s1890_s9 }
  0x12   : > { %s1691_s18 = smul.u32 192, %s1890_s9 }
  0x13   : > { %v1741_v5 = vpop.eup %1740  ;;  %s1910_s21 = scalar_lea.vmem %s2263_s3, %s1690_s17 }
  0x14   : > { %v434_v6 = vmul.f32 16.0, %v1741_v5  ;;  %vm438_vm1 = vweird.f32 %v1741_v5  ;;  %s1915_s28 = scalar_lea.vmem %s2264_s4, %s1691_s18  ;;  %v1533_v32 = vld [vmem:[%s1910_s21] sm:$0xf]  ;;  %v1661_v33 = vld [vmem:[%s1910_s21 + $0x8] sm:$0xf0] }
  0x15   : > { %v1534_v37 = vor.u32 %v1661_v33, %v1533_v32  ;;  %v1925_v38 = vld [vmem:[%s1915_s28 + $0x4] sm:$0xf]  ;;  %v1928_v39 = vld [vmem:[%s1915_s28] sm:$0xf]  ;;  %v1932_v42 = vld [vmem:[%s1915_s28 + $0x8] sm:$0xf] }
  0x16   : > { %431 = vadd.xlane.f32.xlu0 %v430_v3  ;;  %v435_v7 = vsub.f32 1.0, %v434_v6  ;;  %2269 = vst [vmem:[#allocation5_spill] sm:$0xff] %v1925_v38  ;;  %v1935_v43 = vld [vmem:[%s1915_s28 + $0xc] sm:$0xf0]  ;;  %v1938_v44 = vld [vmem:[%s1915_s28 + $0x8] sm:$0xf0] }
  0x17   : > { %2270 = vst [vmem:[#allocation6_spill] sm:$0xff] %v1928_v39  ;;  %609 = vmatpush.bf16.msra.mxu0 %v1534_v37  ;;  %v1945_v46 = vld [vmem:[%s1915_s28 + $0x10] sm:$0xf0]  ;;  %v1948_v47 = vld [vmem:[%s1915_s28 + $0x1c] sm:$0xf] }
  0x18   : > { %v436_v8 = vmul.f32 %v1741_v5, %v435_v7  ;;  %2271 = vst [vmem:[#allocation7_spill] sm:$0xff] %v1932_v42  ;;  %v1951_v50 = vld [vmem:[%s1915_s28 + $0x18] sm:$0xf]  ;;  %v1954_v51 = vld [vmem:[%s1915_s28 + $0x20] sm:$0xf] }
  0x19   : > { %2272 = vst [vmem:[#allocation8_spill] sm:$0xff] %v1935_v43  ;;  %v1957_v52 = vld [vmem:[%s1915_s28 + $0x24] sm:$0xf0]  ;;  %v1960_v54 = vld [vmem:[%s1915_s28 + $0x20] sm:$0xf0] }
  0x1a   : > { %v437_v9 = vadd.f32 %v1741_v5, %v436_v8  ;;  %2273 = vst [vmem:[#allocation9_spill] sm:$0xff] %v1938_v44  ;;  %v1963_v55 = vld [vmem:[%s1915_s28 + $0x28] sm:$0xf0]  ;;  %v1966_v56 = vld [vmem:[%s1915_s28 + $0x34] sm:$0xf] }
  0x1b   : > { %2274 = vst [vmem:[#allocation10_spill] sm:$0xff] %v1945_v46  ;;  %v1969_v58 = vld [vmem:[%s1915_s28 + $0x30] sm:$0xf]  ;;  %v1972_v59 = vld [vmem:[%s1915_s28 + $0x38] sm:$0xf] }
  0x1c   : > { %v439_v10 = vsel %vm438_vm1, %v1741_v5, %v437_v9  ;;  %2275 = vst [vmem:[#allocation11_spill] sm:$0xff] %v1948_v47  ;;  %v1976_v63 = vld [vmem:[%s1915_s28 + $0x3c] sm:$0xf0]  ;;  %v1982_v1 = vld [vmem:[%s1915_s28 + $0x40] sm:$0xf0] }
  0x1d   : > { %2276 = vst [vmem:[#allocation12_spill] sm:$0xff] %v1954_v51  ;;  %v1985_v3 = vld [vmem:[%s1915_s28 + $0x4c] sm:$0xf]  ;;  %v1988_v4 = vld [vmem:[%s1915_s28 + $0x48] sm:$0xf] }
  0x1e   : > { %2277 = vst [vmem:[#allocation13_spill] sm:$0xff] %v1963_v55  ;;  %v1991_v6 = vld [vmem:[%s1915_s28 + $0x50] sm:$0xf]  ;;  %v1994_v7 = vld [vmem:[%s1915_s28 + $0x54] sm:$0xf0] }
  0x1f   : > { %2279 = vst [vmem:[#allocation15_spill] sm:$0xff] %v1982_v1  ;;  %v1997_v8 = vld [vmem:[%s1915_s28 + $0x50] sm:$0xf0]  ;;  %v2046_v33 = vld [vmem:[%s1915_s28 + $0x90] sm:$0xf] }
  0x20   : > { %2280 = vst [vmem:[#allocation16_spill] sm:$0xff] %v1985_v3  ;;  %v2043_v32 = vld [vmem:[%s1915_s28 + $0x94] sm:$0xf]  ;;  %v2052_v36 = vld [vmem:[%s1915_s28 + $0x9c] sm:$0xf0] }
  0x21   : > { %2281 = vst [vmem:[#allocation17_spill] sm:$0xff] %v1988_v4  ;;  %v2055_v37 = vld [vmem:[%s1915_s28 + $0x98] sm:$0xf0]  ;;  %v2070_v60 = vld [vmem:[%s1915_s28 + $0xb4] sm:$0xf0] }
  0x22   : > { %v1662_v46 = vld [vmem:[%s1910_s21 + $0x10] sm:$0xf0] }
  0x81   : > { %v429_v11 = vpop.xlane.xlu0 %428 }
  0x82   : > { %v440_v12 = vmul.f32 %v439_v10, %v429_v11  ;;  %v2004_v11 = vld [vmem:[%s1915_s28 + $0x64] sm:$0xf] }
  0x84   : > { %v442_v13 = vsub.f32 %v424_v0, %v440_v12  ;;  %v1979_v0 = vld [vmem:[%s1915_s28 + $0x38] sm:$0xf0]  ;;  %v2007_v12 = vld [vmem:[%s1915_s28 + $0x60] sm:$0xf] }
  0x85   : > { %2278 = vst [vmem:[#allocation14_spill] sm:$0xff] %v1979_v0 }
  0x86   : > { %v444_v14 = vmul.f32 %v442_v13, %v442_v13 }
  0x88   : > { %v446_v15 = vsel %vm426_vm0, %v444_v14, 0.0 }
  0x89   : > { %447 = vadd.xlane.f32.xlu1 %v446_v15  ;;  %v432_v16 = vpop.xlane.xlu0 %431  ;;  %v2010_v15 = vld [vmem:[%s1915_s28 + $0x68] sm:$0xf] }
  0x8a   : > { %v441_v17 = vmul.f32 %v439_v10, %v432_v16  ;;  %v2013_v16 = vld [vmem:[%s1915_s28 + $0x6c] sm:$0xf0] }
  0x8c   : > { %v1883_v18 = vsub.f32 %v425_v2, %v441_v17 }
  0x8e   : > { %v445_v19 = vmul.f32 %v1883_v18, %v1883_v18 }
  0x90   : > { %v449_v20 = vsel %vm426_vm0, %v445_v19, 0.0  ;;  %v2016_v19 = vld [vmem:[%s1915_s28 + $0x68] sm:$0xf0] }
  0x91   : > { %450 = vadd.xlane.f32.xlu1 %v449_v20  ;;  %v2019_v20 = vld [vmem:[%s1915_s28 + $0x70] sm:$0xf0] }
  0xfc   : > { %v448_v21 = vpop.xlane.xlu1 %447 }
  0xfd   : > { %v452_v22 = vmul.f32 %v448_v21, %v439_v10  ;;  %v2022_v21 = vld [vmem:[%s1915_s28 + $0x7c] sm:$0xf] }
  0xff   : > { %v454_v23 = vadd.f32 1e-05, %v452_v22 }
 0x101   : > { %1742 = vrsqrt.f32 %v454_v23  ;;  %vm462_vm3 = vweird.f32 %v454_v23 }
 0x104   : > { %v451_v24 = vpop.xlane.xlu1 %450 }
 0x105   : > { %v453_v25 = vmul.f32 %v451_v24, %v439_v10  ;;  %v2001_v10 = vld [vmem:[%s1915_s28 + $0x58] sm:$0xf0]  ;;  %v2027_v24 = vld [vmem:[%s1915_s28 + $0x78] sm:$0xf] }
 0x107   : > { %v1743_v26 = vpop.eup %1742  ;;  %v1902_v27 = vadd.f32 1e-05, %v453_v25  ;;  %v2030_v25 = vld [vmem:[%s1915_s28 + $0x80] sm:$0xf] }
 0x108   : > { %v457_v28 = vmul.f32 %v1743_v26, %v454_v23  ;;  %vm463_vm2 = vweird.f32 %v1743_v26 }
 0x109   : > { %1744 = vrsqrt.f32 %v1902_v27  ;;  %vm464_vm4 = vmor %vm462_vm3, %vm463_vm2  ;;  %vm472_vm7 = vweird.f32 %v1902_v27 }
 0x10a   : > { %v458_v29 = vmul.f32 %v1743_v26, %v457_v28  ;;  %v2033_v28 = vld [vmem:[%s1915_s28 + $0x84] sm:$0xf0] }
 0x10c   : > { %v459_v30 = vmul.f32 0.5, %v458_v29  ;;  %v2036_v29 = vld [vmem:[%s1915_s28 + $0x80] sm:$0xf0] }
 0x10e   : > { %v460_v31 = vsub.f32 1.5, %v459_v30  ;;  %v2039_v30 = vld [vmem:[%s1915_s28 + $0x88] sm:$0xf0] }
 0x10f   : > { %v1745_v34 = vpop.eup %1744 }
 0x110   : > { %v461_v40 = vmul.f32 %v1743_v26, %v460_v31  ;;  %v467_v41 = vmul.f32 %v1745_v34, %v1902_v27  ;;  %vm473_vm6 = vweird.f32 %v1745_v34 }
 0x111   : > { %vm474_vm8 = vmor %vm472_vm7, %vm473_vm6 }
 0x112   : > { %v465_v48 = vsel %vm464_vm4, %v1743_v26, %v461_v40  ;;  %v468_v49 = vmul.f32 %v1745_v34, %v467_v41  ;;  %v1813_v26 = vmov 1934713408   ;;  %v2058_v41 = vld [vmem:[%s1915_s28 + $0xa0] sm:$0xf0] }
 0x113   : > { %v476_v53 = vmul.f32 %v465_v48, %v442_v13  ;;  %v495_v13 = vunpack.c.0.s8 %v494_v61  ;;  %v516_v27 = vunpack.c.l.s4 %v1813_v26  ;;  %v2061_v48 = vld [vmem:[%s1915_s28 + $0xac] sm:$0xf]  ;;  %v2073_v61 = vld [vmem:[%s1915_s28 + $0xb0] sm:$0xf0] }
 0x114   : > { %v469_v57 = vmul.f32 0.5, %v468_v49 }
 0x115   : > { %v482_v62 = vmul.f32 %v1922_v35, %v476_v53  ;;  %v517_v53 = vunpack.c.0.s8 %v516_v27 }
 0x116   : > { %v470_v2 = vsub.f32 1.5, %v469_v57  ;;  %v2067_v57 = vld [vmem:[%s1915_s28 + $0xb0] sm:$0xf] }
 0x117   : > { %v488_v5 = vadd.f32 %v1738_v45, %v482_v62 }
 0x118   : > { %v471_v9 = vmul.f32 %v1745_v34, %v470_v2 }
 0x119   : > { %v490_v14 = vrot.slane %v488_v5, 4  ;;  %v496_v31 = vperm.slane %v488_v5, %v495_v13 }
 0x11a   : > { %v475_v17 = vsel %vm474_vm8, %v1745_v34, %v471_v9  ;;  %v2049_v34 = vld [vmem:[%s1915_s28 + $0x98] sm:$0xf]  ;;  %v2083_v9 = vld [vmem:[%s399_s12] ss:$0 sm:$0xff]  ;;  %s1692_s12 = smul.u32 3, %s1890_s9  ;;  %s2150_s9 = smov 0  }
 0x11b   : > { %v492_v22 = vsel %vm491_vm5, 0.0, %v490_v14  ;;  %v477_v23 = vmul.f32 %v475_v17, %v1883_v18  ;;  %v513_v62 = vrot.slane %v496_v31, 4  ;;  %2282 = vst [vmem:[#allocation18_spill] sm:$0xff] %v2083_v9  ;;  %v1660_v14 = vld [vmem:[%s1910_s21 + $0x4] sm:$0xf] }
 0x11c   : > { %v500_v49 = vperm.slane %v492_v22, %v495_v13  ;;  %v1535_v17 = vld [vmem:[%s1910_s21 + $0xc] sm:$0xf0]  ;;  %v1541_v22 = vld [vmem:[%s1910_s21 + $0x8] sm:$0xf]  ;;  %s396_s17 = scalar_lea.vmem %s2265_s5, %s1692_s12 }
 0x11d   : > { %v483_v18 = vmul.f32 %v1922_v35, %v477_v23  ;;  %v2064_v35 = vld [vmem:[%s1915_s28 + $0xa8] sm:$0xf]  ;;  %v1542_v43 = vor.u32 %v1662_v46, %v1541_v22 }
 0x11e   : > { %v525_v42 = vrot.slane %v500_v49, 4 }
 0x11f   : > { %v489_v40 = vadd.f32 %v1738_v45, %v483_v18  ;;  %v2076_v45 = vld [vmem:[%s1915_s28 + $0xb8] sm:$0xf0]  ;;  %v1538_v18 = vor.u32 %v1660_v14, %v1535_v17  ;;  %637 = vmatpush.bf16.msra.mxu2 %v1542_v43 }
 0x121   : > { %v501_v2 = vrot.slane %v489_v40, 4  ;;  %v506_v5 = vperm.slane %v489_v40, %v495_v13  ;;  %623 = vmatpush.bf16.msra.mxu1 %v1538_v18 }
 0x123   : > { %v502_v23 = vsel %vm491_vm5, 0.0, %v501_v2  ;;  %v511_v26 = vrot.slane %v506_v5, 4  ;;  %v514_v27 = vsel %vm491_vm5, %v506_v5, %v513_v62 }
 0x124   : > { %v510_v40 = vperm.slane %v502_v23, %v495_v13  ;;  %v522_v38 = vperm.slane %v514_v27, %v517_v53 }
 0x125   : > { %v512_v44 = vsel %vm491_vm5, %v511_v26, %v496_v31 }
 0x126   : > { %v518_v39 = vperm.slane %v512_v44, %v517_v53  ;;  %v523_v55 = vrot.slane %v510_v40, 4  ;;  %v526_v9 = vsel %vm491_vm5, %v510_v40, %v525_v42  ;;  %v537_v51 = vrot.slane %v522_v38, 4  ;;  %555 = vst [vmem:[#allocation1 + $0x2] ss:$4 sm:$0xff] %v522_v38 }
 0x127   : > { %v534_v2 = vperm.slane %v526_v9, %v517_v53 }
 0x128   : > { %v524_v47 = vsel %vm491_vm5, %v523_v55, %v500_v49  ;;  %v535_v62 = vrot.slane %v518_v39, 4  ;;  %v538_v5 = vsel %vm491_vm5, 0.0, %v537_v51  ;;  %551 = vst [vmem:[#allocation1] ss:$4 sm:$0xff] %v518_v39  ;;  %v575_v39 = vld [vmem:[%s396_s17] sm:$0x7] }
 0x129   : > { %v530_v13 = vperm.slane %v524_v47, %v517_v53  ;;  %v541_v14 = vrot.slane %v534_v2, 4  ;;  %557 = vst [vmem:[#allocation1 + $0x3] ss:$4 sm:$0xff] %v538_v5  ;;  %v578_v47 = vperm.slane %v575_v39, 1  ;;  %v579_v53 = vperm.slane %v575_v39, 2 }
 0x12a   : > { %v536_v46 = vsel %vm491_vm5, 0.0, %v535_v62  ;;  %563 = vst [vmem:[#allocation1 + $0x22] ss:$4 sm:$0xff] %v534_v2  ;;  %v577_v9 = vperm.slane %v575_v39, 0 }
 0x12b   : > { %v539_v44 = vrot.slane %v530_v13, 4  ;;  %v542_v42 = vsel %vm491_vm5, 0.0, %v541_v14  ;;  %553 = vst [vmem:[#allocation1 + $0x1] ss:$4 sm:$0xff] %v536_v46 }
 0x12c   : > { %559 = vst [vmem:[#allocation1 + $0x20] ss:$4 sm:$0xff] %v530_v13 }
 0x12d   : > { %v540_v38 = vsel %vm491_vm5, 0.0, %v539_v44  ;;  %565 = vst [vmem:[#allocation1 + $0x23] ss:$4 sm:$0xff] %v542_v42 }
 0x12e   : > { %561 = vst [vmem:[#allocation1 + $0x21] ss:$4 sm:$0xff] %v540_v38 }
 0x132   : > { %v566_v43 = vld.sshfl [vmem:[#allocation1] sm:$0xff pattern:$0x73625140] }
 0x135   : > { %v567_v55 = vld.sshfl [vmem:[#allocation1 + $0x20] sm:$0xff pattern:$0x73625140] }
 0x136   : > { %v570_v51 = vpack.c.bf16 %v567_v55, %v566_v43 }
 0x138   : > { %1543 = vmatmul.msk.bf16.vlgmr.msra.gmra.mxu0 %vm426_vm0, %v570_v51  ;;  %1544 = vmatmul.msk.bf16.vlgmr.msra.gmra.mxu1 %vm426_vm0, %v570_v51 }
 0x139   : > { %1545 = vmatmul.msk.bf16.vlgmr.msra.gmra.mxu2 %vm426_vm0, %v570_v51  ;;  %vm799_vm0 = vcmask 1042434  }
 0x1b5   : > { %v625_v31 = vpop.f32.mrf.mxu1  ;;  %v611_v17 = vpop.f32.mrf.mxu0 }
 0x1b6   : > { %v626_v49 = vadd.f32 %v625_v31, %v578_v47  ;;  %v612_v27 = vadd.f32 %v611_v17, %v577_v9 }
 0x1b8   : > { %v650_v22 = vrot.slane %v626_v49, 6 }
 0x1ba   : > { %v655_v40 = vsel %vm654_vm9, %v612_v27, %v650_v22  ;;  %v659_v2 = vsel %vm658_vm10, %v612_v27, %v650_v22  ;;  %v664_v42 = vsel %vm663_vm13, %v612_v27, %v650_v22  ;;  %v668_v38 = vsel %vm667_vm14, %v650_v22, %v612_v27 }
 0x1bc   : > { %v639_v23 = vpop.f32.mrf.mxu2 }
 0x1bd   : > { %v640_v26 = vadd.f32 %v639_v23, %v579_v53  ;;  %v627_v13 = vpop.f32.mrf.mxu1 }
 0x1be   : > { %v628_v46 = vadd.f32 %v627_v13, %v578_v47  ;;  %v613_v47 = vpop.f32.mrf.mxu0 }
 0x1bf   : > { %v651_v18 = vrot.slane %v640_v26, 4 }
 0x1c0   : > { %v652_v39 = vrot.slane %v628_v46, 6  ;;  %v614_v46 = vadd.f32 %v613_v47, %v577_v9 }
 0x1c1   : > { %v657_v62 = vsel %vm656_vm11, %v655_v40, %v651_v18  ;;  %v661_v5 = vsel %vm660_vm12, %v659_v2, %v651_v18  ;;  %v665_v55 = vsel %vm656_vm11, %v651_v18, %v664_v42  ;;  %v669_v51 = vsel %vm660_vm12, %v651_v18, %v668_v38 }
 0x1c2   : > { %v662_v14 = vrot.slane %v661_v5, 2  ;;  %682 = vst [vmem:[#allocation1] ss:$4 sm:$0xff] %v657_v62  ;;  %v666_v17 = vrot.slane %v665_v55, 4  ;;  %v670_v23 = vrot.slane %v669_v51, 6 }
 0x1c4   : > { %687 = vst [vmem:[#allocation1 + $0x20] ss:$4 sm:$0xff] %v662_v14  ;;  %v641_v44 = vpop.f32.mrf.mxu2 }
 0x1c5   : > { %v642_v43 = vadd.f32 %v641_v44, %v579_v53 }
 0x1c7   : > { %v653_v2 = vrot.slane %v642_v43, 4  ;;  %v673_v43 = vsel %vm658_vm10, %v614_v46, %v652_v39 }
 0x1c9   : > { %v683_v31 = vld.sshfl [vmem:[#allocation1] sm:$0xff pattern:$0x73625140]  ;;  %v684_v49 = vld.sshfl [vmem:[#allocation1 + $0x8] sm:$0xff pattern:$0x73625140] }
 0x1ca   : > { %v685_v26 = vld.sshfl [vmem:[#allocation1 + $0x10] sm:$0xff pattern:$0x73625140]  ;;  %v739_v40 = vpack.c.bf16 %v684_v49, %v683_v31 }
 0x1cb   : > { %v688_v62 = vld.sshfl [vmem:[#allocation1 + $0x20] sm:$0xff pattern:$0x73625140]  ;;  %v689_v5 = vld.sshfl [vmem:[#allocation1 + $0x28] sm:$0xff pattern:$0x73625140]  ;;  %v740_v13 = vpack.c.bf16 %v685_v26, %v685_v26  ;;  %v674_v26 = vsel %vm660_vm12, %v673_v43, %v653_v2 }
 0x1cc   : > { %v690_v22 = vld.sshfl [vmem:[#allocation1 + $0x30] sm:$0xff pattern:$0x73625140]  ;;  %691 = vst [vmem:[#allocation1] ss:$4 sm:$0xff] %v666_v17  ;;  %v741_v53 = vpack.c.bf16 %v689_v5, %v688_v62  ;;  %v771_v27 = vrot.slane %v739_v40, 3 }
 0x1cd   : > { %695 = vst [vmem:[#allocation1 + $0x20] ss:$4 sm:$0xff] %v670_v23  ;;  %v742_v18 = vpack.c.bf16 %v690_v22, %v690_v22  ;;  %v772_v14 = vrot.slane %v740_v13, 6  ;;  %v773_v44 = vrot.slane %v740_v13, 1  ;;  %v2119_v23 = vld [vmem:[#allocation2] sm:$0x3]  }
 0x1ce   : > { %v774_v42 = vrot.slane %v741_v53, 3  ;;  %v798_v38 = vsel %vm795_vm15, %v739_v40, %v771_v27  ;;  %v675_v40 = vrot.slane %v674_v26, 2 }
 0x1cf   : > { %v775_v55 = vrot.slane %v742_v18, 6  ;;  %v776_v51 = vrot.slane %v742_v18, 1  ;;  %v802_v31 = vsel %vm799_vm0, %v772_v14, %v773_v44  ;;  %v671_v18 = vsel %vm654_vm9, %v614_v46, %v652_v39 }
 0x1d0   : > { %v803_v49 = vsel %vm654_vm9, %v798_v38, %v802_v31  ;;  %v806_v17 = vsel %vm795_vm15, %v741_v53, %v774_v42  ;;  %v672_v44 = vsel %vm656_vm11, %v671_v18, %v653_v2  ;;  %v679_v31 = vsel %vm667_vm14, %v652_v39, %v614_v46 }
 0x1d1   : > { %v809_v62 = vsel %vm799_vm0, %v775_v55, %v776_v51  ;;  %861 = vst [vmem:[#allocation3] sm:$0x7] %v803_v49  ;;  %v676_v51 = vsel %vm663_vm13, %v614_v46, %v652_v39 }
 0x1d2   : > { %v810_v9 = vsel %vm654_vm9, %v806_v17, %v809_v62  ;;  %v677_v26 = vsel %vm656_vm11, %v653_v2, %v676_v51 }
 0x1d3   : > { %862 = vst [vmem:[#allocation3 + $0x3] sm:$0x7] %v810_v9  ;;  %v692_v47 = vld.sshfl [vmem:[#allocation1] sm:$0xff pattern:$0x73625140]  ;;  %v678_v18 = vrot.slane %v677_v26, 4 }
 0x1d4   : > { %v696_v5 = vld.sshfl [vmem:[#allocation1 + $0x20] sm:$0xff pattern:$0x73625140]  ;;  %v697_v13 = vld.sshfl [vmem:[#allocation1 + $0x28] sm:$0xff pattern:$0x73625140] }
 0x1d5   : > { %v698_v22 = vld.sshfl [vmem:[#allocation1 + $0x30] sm:$0xff pattern:$0x73625140]  ;;  %v745_v27 = vpack.c.bf16 %v697_v13, %v696_v5  ;;  %v693_v14 = vld.sshfl [vmem:[#allocation1 + $0x8] sm:$0xff pattern:$0x73625140]  ;;  %v680_v5 = vsel %vm660_vm12, %v653_v2, %v679_v31 }
 0x1d6   : > { %v746_v53 = vpack.c.bf16 %v698_v22, %v698_v22  ;;  %v694_v42 = vld.sshfl [vmem:[#allocation1 + $0x10] sm:$0xff pattern:$0x73625140]  ;;  %703 = vst [vmem:[#allocation1 + $0x20] ss:$4 sm:$0xff] %v675_v40  ;;  %v743_v38 = vpack.c.bf16 %v693_v14, %v692_v47  ;;  %v681_v39 = vrot.slane %v680_v5, 6 }
 0x1d7   : > { %v780_v55 = vrot.slane %v745_v27, 3  ;;  %699 = vst [vmem:[#allocation1] ss:$4 sm:$0xff] %v672_v44  ;;  %v744_v43 = vpack.c.bf16 %v694_v42, %v694_v42 }
 0x1d8   : > { %v781_v49 = vrot.slane %v746_v53, 6  ;;  %v782_v17 = vrot.slane %v746_v53, 1  ;;  %v777_v62 = vrot.slane %v743_v38, 3 }
 0x1d9   : > { %v820_v9 = vsel %vm795_vm15, %v745_v27, %v780_v55  ;;  %v778_v13 = vrot.slane %v744_v43, 6  ;;  %v779_v22 = vrot.slane %v744_v43, 1 }
 0x1da   : > { %v823_v40 = vsel %vm799_vm0, %v781_v49, %v782_v17  ;;  %v813_v46 = vsel %vm795_vm15, %v743_v38, %v777_v62 }
 0x1db   : > { %v824_v47 = vsel %vm654_vm9, %v820_v9, %v823_v40  ;;  %v816_v14 = vsel %vm799_vm0, %v778_v13, %v779_v22 }
 0x1dc   : > { %864 = vst [vmem:[#allocation3 + $0x9] sm:$0x7] %v824_v47  ;;  %v817_v43 = vsel %vm654_vm9, %v813_v46, %v816_v14 }
 0x1dd   : > { %v704_v53 = vld.sshfl [vmem:[#allocation1 + $0x20] sm:$0xff pattern:$0x73625140]  ;;  %v705_v44 = vld.sshfl [vmem:[#allocation1 + $0x28] sm:$0xff pattern:$0x73625140] }
 0x1de   : > { %v700_v42 = vld.sshfl [vmem:[#allocation1] sm:$0xff pattern:$0x73625140]  ;;  %v701_v51 = vld.sshfl [vmem:[#allocation1 + $0x8] sm:$0xff pattern:$0x73625140]  ;;  %v749_v27 = vpack.c.bf16 %v705_v44, %v704_v53 }
 0x1df   : > { %v702_v55 = vld.sshfl [vmem:[#allocation1 + $0x10] sm:$0xff pattern:$0x73625140]  ;;  %v747_v31 = vpack.c.bf16 %v701_v51, %v700_v42  ;;  %863 = vst [vmem:[#allocation3 + $0x6] sm:$0x7] %v817_v43 }
 0x1e0   : > { %v706_v2 = vld.sshfl [vmem:[#allocation1 + $0x30] sm:$0xff pattern:$0x73625140]  ;;  %707 = vst [vmem:[#allocation1] ss:$4 sm:$0xff] %v678_v18  ;;  %v748_v49 = vpack.c.bf16 %v702_v55, %v702_v55  ;;  %v786_v9 = vrot.slane %v749_v27, 3 }
 0x1e1   : > { %v750_v17 = vpack.c.bf16 %v706_v2, %v706_v2  ;;  %711 = vst [vmem:[#allocation1 + $0x20] ss:$4 sm:$0xff] %v681_v39  ;;  %v783_v26 = vrot.slane %v747_v31, 3 }
 0x1e2   : > { %v784_v5 = vrot.slane %v748_v49, 6  ;;  %v785_v38 = vrot.slane %v748_v49, 1  ;;  %v834_v47 = vsel %vm795_vm15, %v749_v27, %v786_v9 }
 0x1e3   : > { %v787_v62 = vrot.slane %v750_v17, 6  ;;  %v788_v13 = vrot.slane %v750_v17, 1  ;;  %v827_v22 = vsel %vm795_vm15, %v747_v31, %v783_v26 }
 0x1e4   : > { %v830_v40 = vsel %vm799_vm0, %v784_v5, %v785_v38 }
 0x1e5   : > { %v837_v53 = vsel %vm799_vm0, %v787_v62, %v788_v13  ;;  %v831_v18 = vsel %vm654_vm9, %v827_v22, %v830_v40 }
 0x1e6   : > { %865 = vst [vmem:[#allocation3 + $0xc] sm:$0x7] %v831_v18  ;;  %v838_v39 = vsel %vm654_vm9, %v834_v47, %v837_v53 }
 0x1e7   : > { %v708_v46 = vld.sshfl [vmem:[#allocation1] sm:$0xff pattern:$0x73625140]  ;;  %v709_v14 = vld.sshfl [vmem:[#allocation1 + $0x8] sm:$0xff pattern:$0x73625140] }
 0x1e8   : > { %v710_v44 = vld.sshfl [vmem:[#allocation1 + $0x10] sm:$0xff pattern:$0x73625140]  ;;  %v712_v42 = vld.sshfl [vmem:[#allocation1 + $0x20] sm:$0xff pattern:$0x73625140]  ;;  %v751_v51 = vpack.c.bf16 %v709_v14, %v708_v46 }
 0x1e9   : > { %v713_v55 = vld.sshfl [vmem:[#allocation1 + $0x28] sm:$0xff pattern:$0x73625140]  ;;  %v714_v2 = vld.sshfl [vmem:[#allocation1 + $0x30] sm:$0xff pattern:$0x73625140]  ;;  %v752_v43 = vpack.c.bf16 %v710_v44, %v710_v44 }
 0x1ea   : > { %v753_v31 = vpack.c.bf16 %v713_v55, %v712_v42  ;;  %v754_v49 = vpack.c.bf16 %v714_v2, %v714_v2  ;;  %v789_v17 = vrot.slane %v751_v51, 3  ;;  %866 = vst [vmem:[#allocation3 + $0xf] sm:$0x7] %v838_v39 }
 0x1eb   : > { %v790_v27 = vrot.slane %v752_v43, 6  ;;  %v791_v9 = vrot.slane %v752_v43, 1 }
 0x1ec   : > { %v792_v26 = vrot.slane %v753_v31, 3  ;;  %v793_v5 = vrot.slane %v754_v49, 6  ;;  %v794_v38 = vrot.slane %v754_v49, 1  ;;  %v841_v62 = vsel %vm795_vm15, %v751_v51, %v789_v17 }
 0x1ed   : > { %v844_v13 = vsel %vm799_vm0, %v790_v27, %v791_v9 }
 0x1ee   : > { %v845_v22 = vsel %vm654_vm9, %v841_v62, %v844_v13  ;;  %v848_v40 = vsel %vm795_vm15, %v753_v31, %v792_v26  ;;  %v851_v47 = vsel %vm799_vm0, %v793_v5, %v794_v38 }
 0x1ef   : > { %v852_v53 = vsel %vm654_vm9, %v848_v40, %v851_v47  ;;  %867 = vst [vmem:[#allocation3 + $0x12] sm:$0x7] %v845_v22 }
 0x1f0   : > { %868 = vst [vmem:[#allocation3 + $0x15] sm:$0x7] %v852_v53 }
 0x1f1 LB: >> { %v1635_v18 = vor.u32 %v2073_v61, %v2064_v35  ;;  %v1639_v46 = vor.u32 %v2061_v48, %v2070_v60  ;;  %v1623_v14 = vor.u32 %v2055_v37, %v2046_v33  ;;  %v1627_v39 = vor.u32 %v2043_v32, %v2052_v36  ;;  %v2283_v4 = vld [vmem:[#allocation17_spill] sm:$0xff]  ;;  %v2284_v3 = vld [vmem:[#allocation16_spill] sm:$0xff]  ;;  %v2285_v0 = vld [vmem:[#allocation14_spill] sm:$0xff]  ;;  %s1547_s18 = sshll.u32 %s1808_s9, 2  ;;  %s1546_s21 = sshll.u32 %s1808_s9, 1  ;;  %s1808_s9 = sphi %s2150_s9, %s911_s9   ;;  %v1804_v23 = vphi %v2119_v23, %v2297_v23  }
 0x1f2   : >> { %v1643_v44 = vor.u32 %v2076_v45, %v2067_v57  ;;  %v1631_v42 = vor.u32 %v2058_v41, %v2049_v34  ;;  %v1611_v51 = vor.u32 %v2036_v29, %v2027_v24  ;;  %v1615_v55 = vor.u32 %v2022_v21, %v2033_v28  ;;  %v2286_v1 = vld [vmem:[#allocation15_spill] sm:$0xff]  ;;  %v2288_v40 = vld [vmem:[#allocation12_spill] sm:$0xff]  ;;  %v2289_v47 = vld [vmem:[#allocation13_spill] sm:$0xff]  ;;  %s916_s19 = ssub.s32 7, %s1547_s18  ;;  %s1688_s8 = sadd.s32 2, %s1547_s18 }
 0x1f3   : >> { %1048 = vmatpush.bf16.msra.mxu0 %v1635_v18  ;;  %1061 = vmatpush.bf16.msra.mxu1 %v1639_v46  ;;  %v1619_v2 = vor.u32 %v2039_v30, %v2030_v25  ;;  %v1599_v43 = vor.u32 %v2016_v19, %v2007_v12  ;;  %v1603_v31 = vor.u32 %v2004_v11, %v2013_v16  ;;  %v2287_v13 = vld [vmem:[#allocation11_spill] sm:$0xff]  ;;  %s917_s20 = smul.u32 %s1792_s24, %s916_s19  ;;  %s1192_s10 = ssub.s32 7, %s1688_s8 }
 0x1f4   : >> { %1196 = vmatpush.bf16.msra.mxu3 %v1635_v18  ;;  %1074 = vmatpush.bf16.msra.mxu2 %v1643_v44  ;;  %v1607_v49 = vor.u32 %v2019_v20, %v2010_v15  ;;  %v1587_v17 = vor.u32 %v1997_v8, %v2283_v4  ;;  %v1591_v27 = vor.u32 %v2284_v3, %v1994_v7  ;;  %v2290_v18 = vld [vmem:[#allocation6_spill] sm:$0xff]  ;;  %s1193_s11 = smul.u32 %s1792_s24, %s1192_s10  ;;  %s911_s9 = sadd.s32 1, %s1808_s9  }
 0x1f5   : >> { %v1595_v9 = vor.u32 %v2001_v10, %v1991_v6  ;;  %v1575_v26 = vor.u32 %v2285_v0, %v1969_v58  ;;  %v1579_v5 = vor.u32 %v1966_v56, %v1976_v63  ;;  %v1583_v38 = vor.u32 %v2286_v1, %v1972_v59  ;;  %v2294_v1 = vld [vmem:[#allocation7_spill] sm:$0xff]  ;;  %v2295_v3 = vld [vmem:[#allocation10_spill] sm:$0xff]  ;;  %s2215_s22 = sadd.s32 %s1546_s21, %s917_s20  ;;  %p908_p5 = scmp.ge.s32.totalorder %s911_s9, 4  }
 0x1f6   : >> { %v1563_v62 = vor.u32 %v1960_v54, %v1951_v50  ;;  %v1567_v22 = vor.u32 %v2287_v13, %v1957_v52  ;;  %v1571_v53 = vor.u32 %v2289_v47, %v2288_v40  ;;  %v1559_v4 = vor.u32 %v2295_v3, %v2294_v1  ;;  %s1087_s23 = smul.u32 3, %s2215_s22  ;;  %s1647_s29 = sshll.u32 %s2215_s22, 1 }
 0x1f7   : >> { %1049 = vmatpush.bf16.msra.mxu0 %v1623_v14  ;;  %1062 = vmatpush.bf16.msra.mxu1 %v1627_v39  ;;  %s1189_s30 = scalar_lea.vmem [#allocation4], %s1647_s29  ;;  %s2232_s13 = sadd.s32 %s1546_s21, %s1193_s11 }
 0x1f8   : >> { %1197 = vmatpush.bf16.msra.mxu3 %v1623_v14  ;;  %1075 = vmatpush.bf16.msra.mxu2 %v1631_v42  ;;  %v2291_v14 = vld [vmem:[#allocation9_spill] sm:$0xff]  ;;  %s1088_s28 = scalar_lea.vmem [#allocation3], %s1087_s23  ;;  %s1444_s12 = smul.u32 3, %s2232_s13 }
 0x1f9   : >> { %v1089_v1 = vld [vmem:[%s1088_s28] sm:$0x7]  ;;  %s1655_s15 = sshll.u32 %s2232_s13, 1 }
 0x1fa   : >> { %v1090_v3 = vunpack.c.l.bf16 %v1089_v1  ;;  %v2296_v1 = vld [vmem:[#allocation18_spill] sm:$0xff]  ;;  %s1445_s14 = scalar_lea.vmem [#allocation3], %s1444_s12  ;;  %s1450_s17 = scalar_lea.vmem [#allocation4], %s1655_s15 }
 0x1fb   : >> { %1050 = vmatpush.bf16.msra.mxu0 %v1611_v51  ;;  %1063 = vmatpush.bf16.msra.mxu1 %v1615_v55 }
 0x1fc   : >> { %1198 = vmatpush.bf16.msra.mxu3 %v1611_v51  ;;  %1076 = vmatpush.bf16.msra.mxu2 %v1619_v2  ;;  %v1551_v51 = vor.u32 %v2291_v14, %v2290_v18 }
 0x1ff   : >> { %1051 = vmatpush.bf16.msra.mxu0 %v1599_v43  ;;  %1064 = vmatpush.bf16.msra.mxu1 %v1603_v31 }
 0x200   : >> { %1199 = vmatpush.bf16.msra.mxu3 %v1599_v43  ;;  %1077 = vmatpush.bf16.msra.mxu2 %v1607_v49  ;;  %v2292_v43 = vld [vmem:[#allocation8_spill] sm:$0xff] }
 0x203   : >> { %1052 = vmatpush.bf16.msra.mxu0 %v1587_v17  ;;  %1065 = vmatpush.bf16.msra.mxu1 %v1591_v27 }
 0x204   : >> { %1200 = vmatpush.bf16.msra.mxu3 %v1587_v17  ;;  %1078 = vmatpush.bf16.msra.mxu2 %v1595_v9  ;;  %v2293_v17 = vld [vmem:[#allocation5_spill] sm:$0xff] }
 0x205   : >> { %v1555_v0 = vor.u32 %v2293_v17, %v2292_v43 }
 0x207   : >> { %1053 = vmatpush.bf16.msra.mxu0 %v1575_v26  ;;  %1066 = vmatpush.bf16.msra.mxu1 %v1579_v5 }
 0x208   : >> { %1201 = vmatpush.bf16.msra.mxu3 %v1575_v26  ;;  %1079 = vmatpush.bf16.msra.mxu2 %v1583_v38  ;;  %v919_v26 = vpack.c.bf16 %v1804_v23, %v1804_v23 }
 0x20b   : >> { %1054 = vmatpush.bf16.msra.mxu0 %v1563_v62  ;;  %1067 = vmatpush.bf16.msra.mxu1 %v1567_v22 }
 0x20c   : >> { %1202 = vmatpush.bf16.msra.mxu3 %v1563_v62  ;;  %1080 = vmatpush.bf16.msra.mxu2 %v1571_v53 }
 0x20f   : >> { %1055 = vmatpush.bf16.msra.mxu0 %v1551_v51  ;;  %1068 = vmatpush.bf16.msra.mxu1 %v1555_v0 }
 0x210   : >> { %1081 = vmatpush.bf16.msra.mxu2 %v1559_v4  ;;  %1203 = vmatpush.bf16.msra.mxu3 %v1551_v51 }
 0x212   : >> { %1056 = vmatmul.bf16.vlgmr.msra.gmra.mxu0 %v919_v26  ;;  %1069 = vmatmul.bf16.vlgmr.msra.gmra.mxu1 %v919_v26 }
 0x213   : >> { %1209 = vmatpush.bf16.msrb.mxu0 %v1639_v46  ;;  %1222 = vmatpush.bf16.msrb.mxu1 %v1643_v44  ;;  %v1112_v46 = vrot.slane %v1090_v3, 2 }
 0x214   : >> { %1082 = vmatmul.bf16.vlgmr.msra.gmra.mxu2 %v919_v26 }
 0x217   : >> { %1210 = vmatpush.bf16.msrb.mxu0 %v1627_v39  ;;  %1223 = vmatpush.bf16.msrb.mxu1 %v1631_v42 }
 0x21b   : >> { %1211 = vmatpush.bf16.msrb.mxu0 %v1615_v55  ;;  %1224 = vmatpush.bf16.msrb.mxu1 %v1619_v2 }
 0x21f   : >> { %1212 = vmatpush.bf16.msrb.mxu0 %v1603_v31  ;;  %1225 = vmatpush.bf16.msrb.mxu1 %v1607_v49 }
 0x223   : >> { %1213 = vmatpush.bf16.msrb.mxu0 %v1591_v27  ;;  %1226 = vmatpush.bf16.msrb.mxu1 %v1595_v9 }
 0x227   : >> { %1214 = vmatpush.bf16.msrb.mxu0 %v1579_v5  ;;  %1227 = vmatpush.bf16.msrb.mxu1 %v1583_v38 }
 0x22b   : >> { %1215 = vmatpush.bf16.msrb.mxu0 %v1567_v22  ;;  %1228 = vmatpush.bf16.msrb.mxu1 %v1571_v53 }
 0x22f   : >> { %1216 = vmatpush.bf16.msrb.mxu0 %v1555_v0  ;;  %1229 = vmatpush.bf16.msrb.mxu1 %v1559_v4 }
 0x28f   : >> { %v1057_v39 = vpop.f32.mrf.mxu0  ;;  %v1070_v44 = vpop.f32.mrf.mxu1 }
 0x290   : >> { %v1091_v42 = vadd.f32 %v1090_v3, %v1057_v39  ;;  %v1114_v55 = vadd.f32 %v1112_v46, %v1070_v44 }
 0x292   : >> { %v1644_v0 = vmul.f32 -1.442695, %v1091_v42  ;;  %v1645_v4 = vmul.f32 -1.442695, %v1114_v55  ;;  %v1136_v42 = vrot.slane %v1090_v3, 4 }
 0x294   : >> { %1746 = vpow2.f32 %v1644_v0 }
 0x295   : >> { %1748 = vpow2.f32 %v1645_v4 }
 0x297   : >> { %v1059_v2 = vpop.f32.mrf.mxu0  ;;  %v1072_v31 = vpop.f32.mrf.mxu1 }
 0x298   : >> { %v1083_v49 = vpop.f32.mrf.mxu2 }
 0x299   : >> { %v1134_v46 = vadd.f32 %v2296_v1, %v1083_v49 }
 0x29a   : >> { %v1747_v27 = vpop.eup %1746 }
 0x29b   : >> { %v1749_v9 = vpop.eup %1748  ;;  %v1095_v5 = vadd.f32 1.0, %v1747_v27 }
 0x29c   : >> { %v1118_v38 = vadd.f32 1.0, %v1749_v9 }
 0x29d   : >> { %1750 = vrcp.f32 %v1095_v5  ;;  %v1107_v14 = vand.u32 2147483648, %v1095_v5  ;;  %v1105_v43 = vand.u32 2147483647, %v1095_v5  ;;  %vm1101_vm2 = vweird.f32 %v1095_v5 }
 0x29e   : >> { %1752 = vrcp.f32 %v1118_v38  ;;  %vm1124_vm5 = vweird.f32 %v1118_v38  ;;  %v1130_v4 = vand.u32 2147483648, %v1118_v38  ;;  %v1128_v31 = vand.u32 2147483647, %v1118_v38 }
 0x29f   : >> { %v1108_v39 = vor.u32 1.1754944e-38, %v1107_v14  ;;  %vm1106_vm4 = vcmp.eq.f32.partialorder %v1105_v43, 8.507059e+37 }
 0x2a0   : >> { %v1085_v62 = vpop.f32.mrf.mxu2  ;;  %vm1129_vm8 = vcmp.eq.f32.partialorder %v1128_v31, 8.507059e+37 }
 0x2a1   : >> { %v1131_v62 = vor.u32 1.1754944e-38, %v1130_v4 }
 0x2a3   : >> { %v1751_v13 = vpop.eup %1750 }
 0x2a4   : >> { %v1753_v22 = vpop.eup %1752  ;;  %v1097_v40 = vmul.f32 %v1751_v13, %v1095_v5  ;;  %vm1102_vm1 = vweird.f32 %v1751_v13 }
 0x2a5   : >> { %v1120_v47 = vmul.f32 %v1753_v22, %v1118_v38  ;;  %vm1103_vm3 = vmor %vm1101_vm2, %vm1102_vm1  ;;  %vm1125_vm6 = vweird.f32 %v1753_v22 }
 0x2a6   : >> { %v1098_v53 = vsub.f32 1.0, %v1097_v40  ;;  %vm1126_vm7 = vmor %vm1124_vm5, %vm1125_vm6 }
 0x2a7   : >> { %v1121_v18 = vsub.f32 1.0, %v1120_v47 }
 0x2a8   : >> { %v1099_v51 = vmul.f32 %v1751_v13, %v1098_v53 }
 0x2a9   : >> { %v1122_v17 = vmul.f32 %v1753_v22, %v1121_v18 }
 0x2aa   : >> { %v1100_v26 = vadd.f32 %v1751_v13, %v1099_v51 }
 0x2ab   : >> { %v1123_v55 = vadd.f32 %v1753_v22, %v1122_v17 }
 0x2ac   : >> { %v1104_v44 = vsel %vm1103_vm3, %v1751_v13, %v1100_v26 }
 0x2ad   : >> { %v1109_v0 = vsel %vm1106_vm4, %v1108_v39, %v1104_v44  ;;  %v1127_v9 = vsel %vm1126_vm7, %v1753_v22, %v1123_v55 }
 0x2ae   : >> { %v1135_v2 = vmul.f32 %v1134_v46, %v1109_v0  ;;  %v1132_v5 = vsel %vm1129_vm8, %v1131_v62, %v1127_v9 }
 0x2af   : >> { %v1140_v49 = vsub.f32 1.0, %v1132_v5  ;;  %v1142_v13 = vmul.f32 %v1804_v23, %v1132_v5 }
 0x2b0   : >> { %v1138_v27 = vadd.f32 %v1136_v42, %v1135_v2 }
 0x2b2   : >> { %1754 = vtanh.f32 %v1138_v27 }
 0x2b8   : >> { %v1755_v40 = vpop.eup %1754 }
 0x2b9   : >> { %v1141_v47 = vmul.f32 %v1755_v40, %v1140_v49 }
 0x2bb   : >> { %v2220_v3 = vadd.f32 %v1142_v13, %v1141_v47 }
 0x2bd   : >> { %v1145_v53 = vmul.f32 0.70710677, %v2220_v3  ;;  %v1195_v18 = vpack.c.bf16 %v2220_v3, %v2220_v3 }
 0x2bf   : >> { %v1146_v38 = vmul.f32 %v1145_v53, %v1145_v53  ;;  %1204 = vmatmul.bf16.vlgmr.msra.gmra.mxu3 %v1195_v18  ;;  %1217 = vmatmul.bf16.vlgmr.msrb.gmra.mxu0 %v1195_v18 }
 0x2c0   : >> { %1230 = vmatmul.bf16.vlgmr.msrb.gmra.mxu1 %v1195_v18 }
 0x2c1   : >> { %v1147_v22 = vmin.f32 %v1146_v38, 16.0 }
 0x2c3   : >> { %v1148_v14 = vmul.f32 2.1237322e-06, %v1147_v22  ;;  %v1159_v51 = vmul.f32 3.8918573e-05, %v1147_v22 }
 0x2c5   : >> { %v1149_v43 = vadd.f32 0.00028619796, %v1148_v14  ;;  %v1160_v17 = vadd.f32 0.001143296, %v1159_v51 }
 0x2c7   : >> { %v1150_v26 = vmul.f32 %v1149_v43, %v1147_v22  ;;  %v1161_v46 = vmul.f32 %v1160_v17, %v1147_v22 }
 0x2c9   : >> { %v1162_v39 = vadd.f32 0.014752088, %v1161_v46  ;;  %v1151_v23 = vadd.f32 0.0036580483, %v1150_v26 }
 0x2cb   : >> { %v1163_v44 = vmul.f32 %v1162_v39, %v1147_v22  ;;  %v1152_v55 = vmul.f32 %v1151_v23, %v1147_v22  ;;  %v1144_v23 = vmul.f32 0.5, %v2220_v3 }
 0x2cd   : >> { %v1164_v42 = vadd.f32 0.112945676, %v1163_v44  ;;  %v1153_v2 = vadd.f32 0.05243302, %v1152_v55 }
 0x2cf   : >> { %v1165_v0 = vmul.f32 %v1164_v42, %v1147_v22  ;;  %v1154_v9 = vmul.f32 %v1153_v2, %v1147_v22 }
 0x2d1   : >> { %v1166_v4 = vadd.f32 0.4994258, %v1165_v0  ;;  %v1155_v62 = vadd.f32 0.18741608, %v1154_v9 }
 0x2d3   : >> { %v1167_v31 = vmul.f32 %v1166_v4, %v1147_v22  ;;  %v1156_v49 = vmul.f32 %v1155_v62, %v1147_v22 }
 0x2d5   : >> { %v1168_v27 = vadd.f32 1.0, %v1167_v31  ;;  %v1157_v18 = vadd.f32 1.1283791, %v1156_v49 }
 0x2d7   : >> { %1756 = vrcp.f32 %v1168_v27  ;;  %v1180_v13 = vand.u32 2147483648, %v1168_v27  ;;  %v1178_v14 = vand.u32 2147483647, %v1168_v27  ;;  %vm1174_vm10 = vweird.f32 %v1168_v27 }
 0x2d8   : >> { %v1158_v17 = vmul.f32 %v1157_v18, %v1145_v53  ;;  %v1650_v53 = vld [vmem:[%s1445_s14 + $0x3] sm:$0x7] }
 0x2d9   : >> { %v1181_v43 = vor.u32 1.1754944e-38, %v1180_v13  ;;  %vm1179_vm12 = vcmp.eq.f32.partialorder %v1178_v14, 8.507059e+37  ;;  %v1238_v55 = vunpack.c.l.bf16 %v1650_v53 }
 0x2db   : >> { %v1260_v0 = vrot.slane %v1238_v55, 2 }
 0x2dd   : >> { %v1757_v5 = vpop.eup %1756 }
 0x2de   : >> { %v1170_v40 = vmul.f32 %v1757_v5, %v1168_v27  ;;  %vm1175_vm9 = vweird.f32 %v1757_v5 }
 0x2df   : >> { %vm1176_vm11 = vmor %vm1174_vm10, %vm1175_vm9  ;;  %vm1348_vm9 = vcmask (%p908_p5), 254976  }
 0x2e0   : >> { %v1171_v47 = vsub.f32 1.0, %v1170_v40 }
 0x2e2   : >> { %v1172_v38 = vmul.f32 %v1757_v5, %v1171_v47 }
 0x2e4   : >> { %v1173_v51 = vadd.f32 %v1757_v5, %v1172_v38 }
 0x2e6   : >> { %v1177_v26 = vsel %vm1176_vm11, %v1757_v5, %v1173_v51 }
 0x2e7   : >> { %v1182_v46 = vsel %vm1179_vm12, %v1181_v43, %v1177_v26 }
 0x2e8   : >> { %v1183_v22 = vmul.f32 %v1182_v46, %v1158_v17 }
 0x2ea   : >> { %v1646_v39 = vclamps-f32 %v1183_v22, 1.0 }
 0x2ec   : >> { %v1186_v44 = vadd.f32 1.0, %v1646_v39 }
 0x2ee   : >> { %v1187_v42 = vmul.f32 %v1186_v44, %v1144_v23 }
 0x2f0   : >> { %1190 = vst [vmem:[%s1189_s30] sm:$0x3] %v1187_v42 }
 0x33c   : >> { %v1218_v4 = vpop.f32.mrf.mxu0 }
 0x33d   : >> { %v1262_v2 = vadd.f32 %v1260_v0, %v1218_v4  ;;  %v1231_v31 = vpop.f32.mrf.mxu1  ;;  %v1284_v4 = vrot.slane %v1238_v55, 4 }
 0x33f   : >> { %v1652_v27 = vmul.f32 -1.442695, %v1262_v2  ;;  %v1282_v2 = vadd.f32 %v2296_v1, %v1231_v31 }
 0x341   : >> { %1758 = vpow2.f32 %v1652_v27 }
 0x342   : >> { %v1205_v9 = vpop.f32.mrf.mxu3 }
 0x343   : >> { %v1239_v62 = vadd.f32 %v1238_v55, %v1205_v9 }
 0x344   : >> { %v1220_v5 = vpop.f32.mrf.mxu0 }
 0x345   : >> { %v1651_v49 = vmul.f32 -1.442695, %v1239_v62  ;;  %v1233_v40 = vpop.f32.mrf.mxu1 }
 0x347   : >> { %v1759_v47 = vpop.eup %1758  ;;  %1760 = vpow2.f32 %v1651_v49 }
 0x348   : >> { %v1266_v13 = vadd.f32 1.0, %v1759_v47 }
 0x34a   : >> { %v1207_v18 = vpop.f32.mrf.mxu3  ;;  %1762 = vrcp.f32 %v1266_v13  ;;  %v1278_v5 = vand.u32 2147483648, %v1266_v13  ;;  %vm1272_vm2 = vweird.f32 %v1266_v13  ;;  %v1276_v40 = vand.u32 2147483647, %v1266_v13 }
 0x34c   : >> { %vm1277_vm4 = vcmp.eq.f32.partialorder %v1276_v40, 8.507059e+37 }
 0x34d   : >> { %v1761_v38 = vpop.eup %1760 }
 0x34e   : >> { %v1243_v14 = vadd.f32 1.0, %v1761_v38  ;;  %v1279_v38 = vor.u32 1.1754944e-38, %v1278_v5 }
 0x350   : >> { %1764 = vrcp.f32 %v1243_v14  ;;  %v1763_v51 = vpop.eup %1762  ;;  %v1255_v39 = vand.u32 2147483648, %v1243_v14  ;;  %v1253_v44 = vand.u32 2147483647, %v1243_v14  ;;  %vm1249_vm14 = vweird.f32 %v1243_v14 }
 0x351   : >> { %v1268_v43 = vmul.f32 %v1763_v51, %v1266_v13  ;;  %vm1273_vm1 = vweird.f32 %v1763_v51 }
 0x352   : >> { %v1256_v0 = vor.u32 1.1754944e-38, %v1255_v39  ;;  %vm1254_vm0 = vcmp.eq.f32.partialorder %v1253_v44, 8.507059e+37  ;;  %vm1274_vm3 = vmor %vm1272_vm2, %vm1273_vm1 }
 0x353   : >> { %v1269_v46 = vsub.f32 1.0, %v1268_v43 }
 0x355   : >> { %v1270_v42 = vmul.f32 %v1763_v51, %v1269_v46 }
 0x356   : >> { %v1765_v17 = vpop.eup %1764 }
 0x357   : >> { %v1245_v26 = vmul.f32 %v1765_v17, %v1243_v14  ;;  %vm1250_vm13 = vweird.f32 %v1765_v17  ;;  %v1271_v9 = vadd.f32 %v1763_v51, %v1270_v42 }
 0x358   : >> { %vm1251_vm15 = vmor %vm1249_vm14, %vm1250_vm13 }
 0x359   : >> { %v1246_v22 = vsub.f32 1.0, %v1245_v26  ;;  %v1275_v18 = vsel %vm1274_vm3, %v1763_v51, %v1271_v9 }
 0x35a   : >> { %v1280_v14 = vsel %vm1277_vm4, %v1279_v38, %v1275_v18 }
 0x35b   : >> { %v1247_v23 = vmul.f32 %v1765_v17, %v1246_v22  ;;  %v1288_v43 = vsub.f32 1.0, %v1280_v14  ;;  %v1290_v31 = vmul.f32 %v1280_v14, %v2220_v3 }
 0x35d   : >> { %v1248_v53 = vadd.f32 %v1765_v17, %v1247_v23 }
 0x35f   : >> { %v1252_v27 = vsel %vm1251_vm15, %v1765_v17, %v1248_v53 }
 0x360   : >> { %v1257_v62 = vsel %vm1254_vm0, %v1256_v0, %v1252_v27 }
 0x361   : >> { %v1283_v49 = vmul.f32 %v1282_v2, %v1257_v62 }
 0x363   : >> { %v1286_v47 = vadd.f32 %v1284_v4, %v1283_v49 }
 0x365   : >> { %1766 = vtanh.f32 %v1286_v47 }
 0x36b   : >> { %v1767_v55 = vpop.eup %1766 }
 0x36c   : >> { %v1289_v17 = vmul.f32 %v1767_v55, %v1288_v43 }
 0x36e   : >> { %v1291_v26 = vadd.f32 %v1290_v31, %v1289_v17  }
 0x370   : >> { %v1293_v46 = vmul.f32 0.70710677, %v1291_v26  ;;  %1339 = vst [vmem:[#allocation2] sm:$0x3] (%p908_p5), %v1291_v26 }
 0x372   : >> { %v1294_v22 = vmul.f32 %v1293_v46, %v1293_v46 }
 0x374   : >> { %v1295_v39 = vmin.f32 %v1294_v22, 16.0 }
 0x376   : >> { %v1296_v23 = vmul.f32 2.1237322e-06, %v1295_v39  ;;  %v1307_v44 = vmul.f32 3.8918573e-05, %v1295_v39 }
 0x378   : >> { %v1297_v42 = vadd.f32 0.00028619796, %v1296_v23  ;;  %v1308_v13 = vadd.f32 0.001143296, %v1307_v44 }
 0x37a   : >> { %v1298_v53 = vmul.f32 %v1297_v42, %v1295_v39  ;;  %v1309_v0 = vmul.f32 %v1308_v13, %v1295_v39 }
 0x37c   : >> { %v1310_v51 = vadd.f32 0.014752088, %v1309_v0  ;;  %v1299_v4 = vadd.f32 0.0036580483, %v1298_v53 }
 0x37e   : >> { %v1311_v2 = vmul.f32 %v1310_v51, %v1295_v39  ;;  %v1300_v9 = vmul.f32 %v1299_v4, %v1295_v39 }
 0x380   : >> { %v1312_v27 = vadd.f32 0.112945676, %v1311_v2  ;;  %v1301_v49 = vadd.f32 0.05243302, %v1300_v9 }
 0x382   : >> { %v1313_v62 = vmul.f32 %v1312_v27, %v1295_v39  ;;  %v1302_v47 = vmul.f32 %v1301_v49, %v1295_v39 }
 0x384   : >> { %v1314_v5 = vadd.f32 0.4994258, %v1313_v62  ;;  %v1303_v18 = vadd.f32 0.18741608, %v1302_v47 }
 0x386   : >> { %v1315_v3 = vmul.f32 %v1314_v5, %v1295_v39  ;;  %v1304_v14 = vmul.f32 %v1303_v18, %v1295_v39  ;;  %v1292_v39 = vmul.f32 0.5, %v1291_v26 }
 0x388   : >> { %v1316_v40 = vadd.f32 1.0, %v1315_v3  ;;  %v1305_v17 = vadd.f32 1.1283791, %v1304_v14 }
 0x38a   : >> { %1768 = vrcp.f32 %v1316_v40  ;;  %v1328_v31 = vand.u32 2147483648, %v1316_v40  ;;  %v1326_v23 = vand.u32 2147483647, %v1316_v40  ;;  %vm1322_vm6 = vweird.f32 %v1316_v40 }
 0x38b   : >> { %v1306_v13 = vmul.f32 %v1305_v17, %v1293_v46 }
 0x38c   : >> { %v1329_v42 = vor.u32 1.1754944e-38, %v1328_v31  ;;  %vm1327_vm8 = vcmp.eq.f32.partialorder %v1326_v23, 8.507059e+37  ;;  %v2297_v23 = vmov %v1291_v26 }
 0x390   : >> { %v1769_v38 = vpop.eup %1768 }
 0x391   : >> { %v1318_v43 = vmul.f32 %v1769_v38, %v1316_v40  ;;  %vm1323_vm5 = vweird.f32 %v1769_v38 }
 0x392   : >> { %vm1324_vm7 = vmor %vm1322_vm6, %vm1323_vm5 }
 0x393   : >> { %v1319_v55 = vsub.f32 1.0, %v1318_v43 }
 0x395   : >> { %v1320_v22 = vmul.f32 %v1769_v38, %v1319_v55 }
 0x397   : >> { %v1321_v44 = vadd.f32 %v1769_v38, %v1320_v22 }
 0x399   : >> { %v1325_v53 = vsel %vm1324_vm7, %v1769_v38, %v1321_v44 }
 0x39a   : >> { %v1330_v0 = vsel %vm1327_vm8, %v1329_v42, %v1325_v53 }
 0x39b   : >> { %v1331_v51 = vmul.f32 %v1330_v0, %v1306_v13 }
 0x39d   : >> { %v1653_v4 = vclamps-f32 %v1331_v51, 1.0 }
 0x39f   : >> { %v1334_v2 = vadd.f32 1.0, %v1653_v4  ;;  %910 = sbr.rel (!%p908_p5) target bundleno = 497 (0x1f1), region = 113 }
 0x3a1   : >> { %v1335_v27 = vmul.f32 %v1334_v2, %v1292_v39 }
 0x3a3   : >> { %1656 = vst [vmem:[%s1450_s17 + $0x2] sm:$0x3] %v1335_v27 }
 0x3aa   : > { %v1340_v46 = vld [vmem:[#allocation4] sm:$0x3]  ;;  %v1341_v9 = vld [vmem:[#allocation4 + $0x2] sm:$0x3]  ;;  %v1342_v62 = vld [vmem:[#allocation4 + $0x4] sm:$0x3] }
 0x3ab   : > { %1349 = vst.msk [vmem:[%s1900_s16] sm:$0x3] %vm1348_vm9, %v1340_v46  ;;  %v1343_v5 = vld [vmem:[#allocation4 + $0x6] sm:$0x3]  ;;  %v1344_v49 = vld [vmem:[#allocation4 + $0x8] sm:$0x3] }
 0x3ac   : > { %1350 = vst.msk [vmem:[%s1900_s16 + $0x2] sm:$0x3] %vm1348_vm9, %v1341_v9  ;;  %v1345_v3 = vld [vmem:[#allocation4 + $0xa] sm:$0x3]  ;;  %v1346_v50 = vld [vmem:[#allocation4 + $0xc] sm:$0x3] }
 0x3ad   : > { %1351 = vst.msk [vmem:[%s1900_s16 + $0x4] sm:$0x3] %vm1348_vm9, %v1342_v62  ;;  %v1347_v52 = vld [vmem:[#allocation4 + $0xe] sm:$0x3] }
 0x3ae   : > { %1352 = vst.msk [vmem:[%s1900_s16 + $0x6] sm:$0x3] %vm1348_vm9, %v1343_v5 }
 0x3af   : > { %1353 = vst.msk [vmem:[%s1900_s16 + $0x8] sm:$0x3] %vm1348_vm9, %v1344_v49 }
 0x3b0   : > { %1354 = vst.msk [vmem:[%s1900_s16 + $0xa] sm:$0x3] %vm1348_vm9, %v1345_v3 }
 0x3b1   : > { %1355 = vst.msk [vmem:[%s1900_s16 + $0xc] sm:$0x3] %vm1348_vm9, %v1346_v50 }
 0x3b2   : > { %1356 = vst.msk [vmem:[%s1900_s16 + $0xe] sm:$0x3] %vm1348_vm9, %v1347_v52 }
 0x3b3 PF: > { %s17_s26 = sadd.s32 1, %s1800_s26   ;;  %s2298_s24 = smov %s1796_s25 }
 0x3b4   : > { %p14_p6 = scmp.ge.s32.totalorder %s17_s26, 4   ;;  %s2299_s25 = smov %s2301_s27 }
 0x3b6   :  { %16 = sbr.rel (!%p14_p6) target bundleno = 2 (0x2), region = 124 }

</bundles_post_ra>
